<compile_context>
chip_gen: v7x
topology: tpu7x:2x2x1
jax: 0.10.0
libtpu: 0.0.40
codegen_flags: <defaults>
</compile_context>

<pallas_src>
import math

import jax
import jax.numpy as jnp
from jax import lax
from jax.experimental import pallas as pl
from jax.experimental.pallas import tpu as pltpu

VOCAB = 50
MAX_POS = 16
HIDDEN = 32
N_HEADS = 4
HEAD_DIM = HIDDEN // N_HEADS
FFN = 4 * HIDDEN
N_LAYERS = 2          # TODO(synk): real DistilBERT has 6 layers; scaled down for the demo
N_CLASSES = 3
CLS_PAD = 128         # classifier output padded to a full 128-lane tile
QKV_PAD = 128         # fused QKV output padded from 3H=96 to a full 128-lane tile
LN_EPS = 1e-12
MASK_NEG = -1e9
SCALE = 1.0 / math.sqrt(HEAD_DIM)   # folded into the Q columns of qkv_w at init
MXU_DTYPE = jnp.bfloat16            # bf16 MXU operands, f32 accumulation


def _mm(a, b):
    # bf16-in / f32-accumulate matmul on the MXU.
    return jnp.dot(a.astype(MXU_DTYPE), b.astype(MXU_DTYPE),
                   preferred_element_type=jnp.float32)


def _layernorm(y, g, b):
    mu = jnp.mean(y, axis=-1, keepdims=True)
    var = jnp.mean(jnp.square(y - mu), axis=-1, keepdims=True)
    return (y - mu) * lax.rsqrt(var + LN_EPS) * g + b


# ---------------- single fused Pallas kernel (whole model) ----------------

def make_kernel(BB, S):
    """Kernel over one batch block of BB sequences of length S."""
    R = BB * S   # flattened row count for QKV / FFN / LayerNorm matmuls

    def model_kernel(x_emb_ref, bias_ref, emb_g_ref, emb_b_ref,
                     qkv_w_ref, qkv_b_ref, o_w_ref, o_b_ref,
                     ln1_g_ref, ln1_b_ref,
                     ff1_w_ref, ff1_b_ref, ff2_w_ref, ff2_b_ref,
                     ln2_g_ref, ln2_b_ref,
                     pre_w_ref, pre_b_ref, cls_w_ref, cls_b_ref,
                     out_ref):
        # Embedding LayerNorm on the flattened (BB*S, H) rows.
        x = _layernorm(x_emb_ref[...].reshape(R, HIDDEN),
                       emb_g_ref[...], emb_b_ref[...])          # (R, H) f32
        bias = bias_ref[...]                                    # (BB, 1, S) additive key mask

        # Static layer loop: weights are indexed with constant l (zero-cost slices),
        # activation x is carried as a value — no HBM round-trips, no scratch.
        for l in range(N_LAYERS):
            # Fused QKV projection; (R, 128) lane-dense result, one bf16 cast.
            qkv = (_mm(x, qkv_w_ref[l]) + qkv_b_ref[l]).astype(MXU_DTYPE)
            q = qkv[:, 0:HIDDEN]                 # SCALE already folded into weights
            k = qkv[:, HIDDEN:2 * HIDDEN]
            v = qkv[:, 2 * HIDDEN:3 * HIDDEN]

            # Attention: heads batched into a single score / p@v einsum per sequence.
            ctx_list = []
            for bb in range(BB):
                sl = slice(bb * S, (bb + 1) * S)
                qb = jnp.swapaxes(q[sl].reshape(S, N_HEADS, HEAD_DIM), 0, 1)  # (h, S, d)
                kb = jnp.swapaxes(k[sl].reshape(S, N_HEADS, HEAD_DIM), 0, 1)
                vb = jnp.swapaxes(v[sl].reshape(S, N_HEADS, HEAD_DIM), 0, 1)
                s = jnp.einsum('hqd,hkd->hqk', qb, kb,
                               preferred_element_type=jnp.float32)            # (h, S, S)
                s = s + bias[bb]                                               # key mask
                m = jnp.max(s, axis=-1, keepdims=True)
                p = jnp.exp(s - m)
                p = p * pl.reciprocal(jnp.sum(p, axis=-1, keepdims=True),
                                      approx=True)
                ctx = jnp.einsum('hqk,hkd->hqd', p.astype(MXU_DTYPE), vb,
                                 preferred_element_type=jnp.float32)           # (h, S, d)
                ctx_list.append(jnp.swapaxes(ctx, 0, 1).reshape(S, HIDDEN))
            ctx_all = ctx_list[0] if BB == 1 else jnp.concatenate(ctx_list, axis=0)

            attn_out = _mm(ctx_all, o_w_ref[l]) + o_b_ref[l]
            x1 = _layernorm(attn_out + x, ln1_g_ref[l], ln1_b_ref[l])   # post-LN (DistilBERT)

            hmid = _mm(x1, ff1_w_ref[l]) + ff1_b_ref[l]
            hmid = jax.nn.gelu(hmid, approximate=True)                  # tanh GELU -> EUP
            ff = _mm(hmid, ff2_w_ref[l]) + ff2_b_ref[l]
            x = _layernorm(ff + x1, ln2_g_ref[l], ln2_b_ref[l])         # carry to next layer

        # Classification head on the CLS token (position 0 of each sequence).
        pooler = x.reshape(BB, S, HIDDEN)[:, 0, :]                      # (BB, H)
        hh = jnp.maximum(_mm(pooler, pre_w_ref[...]) + pre_b_ref[...], 0.0)
        # TODO(synk): nn.Dropout(0.3) is identity in eval mode; training dropout not implemented.
        out = _mm(hh, cls_w_ref[...]) + cls_b_ref[...]                  # (BB, CLS_PAD) lane-dense
        out_ref[...] = out[:, None, :]

    return model_kernel


# ---------------- model glue (plain JAX) ----------------

@jax.jit
def distilbert_class_forward(params, input_ids, attention_mask):
    B, S = input_ids.shape
    # Embedding gather stays in XLA (table is HBM-resident at real size).
    emb = params["word_emb"][input_ids] + params["pos_emb"][jnp.arange(S)][None]
    x_emb = emb.astype(jnp.float32)                          # (B, S, H)
    # Additive key mask, kept compact as (B, 1, S); broadcast inside the kernel.
    bias = ((1.0 - attention_mask.astype(jnp.float32)) * MASK_NEG)[:, None, :]

    # 2 parallel batch blocks when possible (feeds both v7x TensorCores); a single
    # block otherwise.  Per-step overhead (~0.35 us) makes more blocks pointless here.
    num_blocks = 2 if (B >= 2 and B % 2 == 0) else 1
    BB = B // num_blocks

    def batch_spec(shape):
        return pl.BlockSpec((BB,) + shape[1:], lambda i: (i, 0, 0))

    def full_spec(shape):
        idx = (0,) * len(shape)
        return pl.BlockSpec(shape, lambda i, _idx=idx: _idx)   # constant block -> DMA'd once

    weight_keys = ("emb_ln_g", "emb_ln_b",
                   "qkv_w", "qkv_b", "o_w", "o_b",
                   "ln1_g", "ln1_b",
                   "ff1_w", "ff1_b", "ff2_w", "ff2_b",
                   "ln2_g", "ln2_b",
                   "pre_w", "pre_b", "cls_w", "cls_b")

    args = (x_emb, bias) + tuple(params[k] for k in weight_keys)
    in_specs = ([batch_spec(x_emb.shape), batch_spec(bias.shape)]
                + [full_spec(params[k].shape) for k in weight_keys])

    out = pl.pallas_call(
        make_kernel(BB, S),
        out_shape=jax.ShapeDtypeStruct((B, 1, CLS_PAD), jnp.float32),
        grid=(num_blocks,),
        in_specs=in_specs,
        out_specs=pl.BlockSpec((BB, 1, CLS_PAD), lambda i: (i, 0, 0)),
        compiler_params=pltpu.CompilerParams(
            dimension_semantics=("parallel",)),
    )(*args)
    return out[:, 0, :N_CLASSES]                             # (B, 3)


def init_params(key):
    def dense(k, fi, fo):
        return 0.02 * jax.random.normal(k, (fi, fo), jnp.float32)

    keys = jax.random.split(key, 4 + N_LAYERS)

    qkv_w, o_w, ff1_w, ff2_w = [], [], [], []
    for l in range(N_LAYERS):
        lk = jax.random.split(keys[4 + l], 6)
        qw = dense(lk[0], HIDDEN, HIDDEN) * SCALE            # fold 1/sqrt(d) into Q
        kw = dense(lk[1], HIDDEN, HIDDEN)
        vw = dense(lk[2], HIDDEN, HIDDEN)
        w = jnp.concatenate([qw, kw, vw], axis=1)            # (H, 3H)
        w = jnp.pad(w, ((0, 0), (0, QKV_PAD - 3 * HIDDEN)))  # lane-dense (H, 128)
        qkv_w.append(w)
        o_w.append(dense(lk[3], HIDDEN, HIDDEN))
        ff1_w.append(dense(lk[4], HIDDEN, FFN))
        ff2_w.append(dense(lk[5], FFN, HIDDEN))

    cls_w_pad = jnp.zeros((HIDDEN, CLS_PAD), jnp.float32)
    cls_w_pad = cls_w_pad.at[:, :N_CLASSES].set(dense(keys[3], HIDDEN, N_CLASSES))

    zeros_h = lambda: jnp.zeros((N_LAYERS, 1, HIDDEN), jnp.float32)
    ones_h = lambda: jnp.ones((N_LAYERS, 1, HIDDEN), jnp.float32)

    return {
        "word_emb": 0.02 * jax.random.normal(keys[0], (VOCAB, HIDDEN), jnp.float32),
        "pos_emb": 0.02 * jax.random.normal(keys[1], (MAX_POS, HIDDEN), jnp.float32),
        "emb_ln_g": jnp.ones((1, HIDDEN), jnp.float32),
        "emb_ln_b": jnp.zeros((1, HIDDEN), jnp.float32),
        # stacked (layer-major) encoder weights; matmul operands stored in bf16
        "qkv_w": jnp.stack(qkv_w).astype(MXU_DTYPE),           # (L, H, 128), Q pre-scaled
        "qkv_b": jnp.zeros((N_LAYERS, 1, QKV_PAD), jnp.float32),
        "o_w": jnp.stack(o_w).astype(MXU_DTYPE),               # (L, H, H)
        "o_b": zeros_h(),
        "ln1_g": ones_h(), "ln1_b": zeros_h(),
        "ff1_w": jnp.stack(ff1_w).astype(MXU_DTYPE),           # (L, H, FFN)
        "ff1_b": jnp.zeros((N_LAYERS, 1, FFN), jnp.float32),
        "ff2_w": jnp.stack(ff2_w).astype(MXU_DTYPE),           # (L, FFN, H)
        "ff2_b": zeros_h(),
        "ln2_g": ones_h(), "ln2_b": zeros_h(),
        "pre_w": dense(keys[2], HIDDEN, HIDDEN).astype(MXU_DTYPE),
        "pre_b": jnp.zeros((1, HIDDEN), jnp.float32),
        "cls_w": cls_w_pad.astype(MXU_DTYPE),                  # (H, CLS_PAD), cols >=3 are zero
        "cls_b": jnp.zeros((1, CLS_PAD), jnp.float32),
    }


if __name__ == "__main__":
    key = jax.random.PRNGKey(0)
    pkey, ikey = jax.random.split(key)
    params = init_params(pkey)

    B, S = 2, 8
    input_ids = jax.random.randint(ikey, (B, S), 0, VOCAB, dtype=jnp.int32)
    attention_mask = jnp.ones((B, S), jnp.int32).at[1, 6:].set(0)  # some padding

    logits = distilbert_class_forward(params, input_ids, attention_mask)
    jax.block_until_ready(logits)
    assert logits.shape == (B, N_CLASSES) and logits.dtype == jnp.float32
    print("KERNEL_OK")
</pallas_src>

<mosaic_0001>
module attributes {stable_mosaic.version = 11 : i64} {
  func.func @model_kernel(%arg0: i32, %arg1: memref<1x8x32xf32, #tpu.memory_space<vmem>>, %arg2: memref<1x1x8xf32, #tpu.memory_space<vmem>>, %arg3: memref<1x32xf32, #tpu.memory_space<vmem>>, %arg4: memref<1x32xf32, #tpu.memory_space<vmem>>, %arg5: memref<2x32x128xbf16, #tpu.memory_space<vmem>>, %arg6: memref<2x1x128xf32, #tpu.memory_space<vmem>>, %arg7: memref<2x32x32xbf16, #tpu.memory_space<vmem>>, %arg8: memref<2x1x32xf32, #tpu.memory_space<vmem>>, %arg9: memref<2x1x32xf32, #tpu.memory_space<vmem>>, %arg10: memref<2x1x32xf32, #tpu.memory_space<vmem>>, %arg11: memref<2x32x128xbf16, #tpu.memory_space<vmem>>, %arg12: memref<2x1x128xf32, #tpu.memory_space<vmem>>, %arg13: memref<2x128x32xbf16, #tpu.memory_space<vmem>>, %arg14: memref<2x1x32xf32, #tpu.memory_space<vmem>>, %arg15: memref<2x1x32xf32, #tpu.memory_space<vmem>>, %arg16: memref<2x1x32xf32, #tpu.memory_space<vmem>>, %arg17: memref<32x32xbf16, #tpu.memory_space<vmem>>, %arg18: memref<1x32xf32, #tpu.memory_space<vmem>>, %arg19: memref<32x128xbf16, #tpu.memory_space<vmem>>, %arg20: memref<1x128xf32, #tpu.memory_space<vmem>>, %arg21: memref<1x1x128xf32, #tpu.memory_space<vmem>>) attributes {dimension_semantics = [#tpu.dimension_semantics<parallel>], iteration_bounds = array<i64: 2>, scalar_prefetch = 0 : i64, scratch_operands = 0 : i64, tpu.core_type = #tpu.core_type<tc>, window_params = [{transform_indices = @transform_0, window_bounds = array<i64: 1, 8, 32>}, {transform_indices = @transform_1, window_bounds = array<i64: 1, 1, 8>}, {pipeline_mode = #tpu.pipeline_mode<synchronous>, transform_indices = @transform_2, window_bounds = array<i64: 1, 32>}, {pipeline_mode = #tpu.pipeline_mode<synchronous>, transform_indices = @transform_3, window_bounds = array<i64: 1, 32>}, {pipeline_mode = #tpu.pipeline_mode<synchronous>, transform_indices = @transform_4, window_bounds = array<i64: 2, 32, 128>}, {pipeline_mode = #tpu.pipeline_mode<synchronous>, transform_indices = @transform_5, window_bounds = array<i64: 2, 1, 128>}, {pipeline_mode = #tpu.pipeline_mode<synchronous>, transform_indices = @transform_6, window_bounds = array<i64: 2, 32, 32>}, {pipeline_mode = #tpu.pipeline_mode<synchronous>, transform_indices = @transform_7, window_bounds = array<i64: 2, 1, 32>}, {pipeline_mode = #tpu.pipeline_mode<synchronous>, transform_indices = @transform_8, window_bounds = array<i64: 2, 1, 32>}, {pipeline_mode = #tpu.pipeline_mode<synchronous>, transform_indices = @transform_9, window_bounds = array<i64: 2, 1, 32>}, {pipeline_mode = #tpu.pipeline_mode<synchronous>, transform_indices = @transform_10, window_bounds = array<i64: 2, 32, 128>}, {pipeline_mode = #tpu.pipeline_mode<synchronous>, transform_indices = @transform_11, window_bounds = array<i64: 2, 1, 128>}, {pipeline_mode = #tpu.pipeline_mode<synchronous>, transform_indices = @transform_12, window_bounds = array<i64: 2, 128, 32>}, {pipeline_mode = #tpu.pipeline_mode<synchronous>, transform_indices = @transform_13, window_bounds = array<i64: 2, 1, 32>}, {pipeline_mode = #tpu.pipeline_mode<synchronous>, transform_indices = @transform_14, window_bounds = array<i64: 2, 1, 32>}, {pipeline_mode = #tpu.pipeline_mode<synchronous>, transform_indices = @transform_15, window_bounds = array<i64: 2, 1, 32>}, {pipeline_mode = #tpu.pipeline_mode<synchronous>, transform_indices = @transform_16, window_bounds = array<i64: 32, 32>}, {pipeline_mode = #tpu.pipeline_mode<synchronous>, transform_indices = @transform_17, window_bounds = array<i64: 1, 32>}, {pipeline_mode = #tpu.pipeline_mode<synchronous>, transform_indices = @transform_18, window_bounds = array<i64: 32, 128>}, {pipeline_mode = #tpu.pipeline_mode<synchronous>, transform_indices = @transform_19, window_bounds = array<i64: 1, 128>}, {transform_indices = @transform_20, window_bounds = array<i64: 1, 1, 128>}]} {
    %c0 = arith.constant 0 : index
    %c0_0 = arith.constant 0 : index
    %c0_1 = arith.constant 0 : index
    %0 = vector.load %arg1[%c0, %c0_0, %c0_1] : memref<1x8x32xf32, #tpu.memory_space<vmem>>, vector<1x8x32xf32>
    %1 = vector.shape_cast %0 : vector<1x8x32xf32> to vector<8x32xf32>
    %c0_2 = arith.constant 0 : index
    %c0_3 = arith.constant 0 : index
    %2 = vector.load %arg3[%c0_2, %c0_3] : memref<1x32xf32, #tpu.memory_space<vmem>>, vector<1x32xf32>
    %c0_4 = arith.constant 0 : index
    %c0_5 = arith.constant 0 : index
    %3 = vector.load %arg4[%c0_4, %c0_5] : memref<1x32xf32, #tpu.memory_space<vmem>>, vector<1x32xf32>
    %cst = arith.constant dense<0.000000e+00> : vector<8xf32>
    %4 = vector.multi_reduction <add>, %1, %cst [1] : vector<8x32xf32> to vector<8xf32>
    %5 = vector.shape_cast %4 : vector<8xf32> to vector<8x1xf32>
    %cst_6 = arith.constant 3.200000e+01 : f32
    %6 = vector.broadcast %cst_6 : f32 to vector<8x1xf32>
    %7 = arith.divf %5, %6 : vector<8x1xf32>
    %8 = vector.broadcast %7 : vector<8x1xf32> to vector<8x32xf32>
    %9 = arith.subf %1, %8 : vector<8x32xf32>
    %10 = arith.mulf %9, %9 : vector<8x32xf32>
    %cst_7 = arith.constant dense<0.000000e+00> : vector<8xf32>
    %11 = vector.multi_reduction <add>, %10, %cst_7 [1] : vector<8x32xf32> to vector<8xf32>
    %12 = vector.shape_cast %11 : vector<8xf32> to vector<8x1xf32>
    %cst_8 = arith.constant 3.200000e+01 : f32
    %13 = vector.broadcast %cst_8 : f32 to vector<8x1xf32>
    %14 = arith.divf %12, %13 : vector<8x1xf32>
    %15 = vector.broadcast %7 : vector<8x1xf32> to vector<8x32xf32>
    %16 = arith.subf %1, %15 : vector<8x32xf32>
    %cst_9 = arith.constant 9.99999996E-13 : f32
    %17 = vector.broadcast %cst_9 : f32 to vector<8x1xf32>
    %18 = arith.addf %14, %17 : vector<8x1xf32>
    %19 = math.rsqrt %18 : vector<8x1xf32>
    %20 = vector.broadcast %19 : vector<8x1xf32> to vector<8x32xf32>
    %21 = arith.mulf %16, %20 : vector<8x32xf32>
    %22 = vector.broadcast %2 : vector<1x32xf32> to vector<8x32xf32>
    %23 = arith.mulf %21, %22 : vector<8x32xf32>
    %24 = vector.broadcast %3 : vector<1x32xf32> to vector<8x32xf32>
    %25 = arith.addf %23, %24 : vector<8x32xf32>
    %c0_10 = arith.constant 0 : index
    %c0_11 = arith.constant 0 : index
    %c0_12 = arith.constant 0 : index
    %26 = vector.load %arg2[%c0_10, %c0_11, %c0_12] : memref<1x1x8xf32, #tpu.memory_space<vmem>>, vector<1x1x8xf32>
    %c0_13 = arith.constant 0 : index
    %c0_14 = arith.constant 0 : index
    %c0_15 = arith.constant 0 : index
    %27 = vector.load %arg5[%c0_13, %c0_14, %c0_15] : memref<2x32x128xbf16, #tpu.memory_space<vmem>>, vector<1x32x128xbf16>
    %28 = vector.shape_cast %27 : vector<1x32x128xbf16> to vector<32x128xbf16>
    %29 = arith.truncf %25 : vector<8x32xf32> to vector<8x32xbf16>
    %cst_16 = arith.constant dense<0.000000e+00> : vector<8x128xf32>
    %30 = tpu.matmul %29, %28, %cst_16 {dimension_numbers = #tpu.dot_dimension_numbers<[1], [0], [0], [1], [0, 0, 1, 1], [], []>} : vector<8x32xbf16>, vector<32x128xbf16>, vector<8x128xf32> -> vector<8x128xf32>
    %c0_17 = arith.constant 0 : index
    %c0_18 = arith.constant 0 : index
    %c0_19 = arith.constant 0 : index
    %31 = vector.load %arg6[%c0_17, %c0_18, %c0_19] : memref<2x1x128xf32, #tpu.memory_space<vmem>>, vector<1x1x128xf32>
    %32 = vector.shape_cast %31 : vector<1x1x128xf32> to vector<1x128xf32>
    %33 = vector.broadcast %32 : vector<1x128xf32> to vector<8x128xf32>
    %34 = arith.addf %30, %33 : vector<8x128xf32>
    %35 = arith.truncf %34 : vector<8x128xf32> to vector<8x128xbf16>
    %36 = vector.extract_strided_slice %35 {offsets = [0, 0], sizes = [8, 32], strides = [1, 1]} : vector<8x128xbf16> to vector<8x32xbf16>
    %37 = vector.extract_strided_slice %35 {offsets = [0, 32], sizes = [8, 32], strides = [1, 1]} : vector<8x128xbf16> to vector<8x32xbf16>
    %38 = vector.extract_strided_slice %35 {offsets = [0, 64], sizes = [8, 32], strides = [1, 1]} : vector<8x128xbf16> to vector<8x32xbf16>
    %39 = vector.shape_cast %36 : vector<8x32xbf16> to vector<8x4x8xbf16>
    %40 = tpu.transpose %39, [1, 0, 2] : vector<8x4x8xbf16> -> vector<4x8x8xbf16>
    %41 = vector.shape_cast %37 : vector<8x32xbf16> to vector<8x4x8xbf16>
    %42 = tpu.transpose %41, [1, 0, 2] : vector<8x4x8xbf16> -> vector<4x8x8xbf16>
    %43 = vector.shape_cast %38 : vector<8x32xbf16> to vector<8x4x8xbf16>
    %44 = tpu.transpose %43, [1, 0, 2] : vector<8x4x8xbf16> -> vector<4x8x8xbf16>
    "tpu.trace_start"() <{level = 10 : i32, message = "hqd,hkd->hqk"}> : () -> ()
    %cst_20 = arith.constant dense<0.000000e+00> : vector<4x8x8xf32>
    %45 = tpu.matmul %40, %42, %cst_20 {dimension_numbers = #tpu.dot_dimension_numbers<[2], [2], [1], [1], [0, 0, 0, 1, 1, 1], [0], [0]>} : vector<4x8x8xbf16>, vector<4x8x8xbf16>, vector<4x8x8xf32> -> vector<4x8x8xf32>
    "tpu.trace_stop"() : () -> ()
    %46 = vector.shape_cast %26 : vector<1x1x8xf32> to vector<1x8xf32>
    %47 = vector.shape_cast %46 : vector<1x8xf32> to vector<1x1x8xf32>
    %48 = vector.broadcast %47 : vector<1x1x8xf32> to vector<4x8x8xf32>
    %49 = arith.addf %45, %48 : vector<4x8x8xf32>
    %cst_21 = arith.constant dense<0xFF800000> : vector<4x8xf32>
    %50 = vector.multi_reduction <maximumf>, %49, %cst_21 [2] : vector<4x8x8xf32> to vector<4x8xf32>
    %51 = vector.shape_cast %50 : vector<4x8xf32> to vector<4x8x1xf32>
    %52 = vector.broadcast %51 : vector<4x8x1xf32> to vector<4x8x8xf32>
    %53 = arith.subf %49, %52 : vector<4x8x8xf32>
    %54 = math.exp %53 : vector<4x8x8xf32>
    %cst_22 = arith.constant dense<0.000000e+00> : vector<4x8xf32>
    %55 = vector.multi_reduction <add>, %54, %cst_22 [2] : vector<4x8x8xf32> to vector<4x8xf32>
    %56 = vector.shape_cast %55 : vector<4x8xf32> to vector<4x8x1xf32>
    %57 = tpu.reciprocal %56 {approx = true} : vector<4x8x1xf32> -> vector<4x8x1xf32>
    %58 = vector.broadcast %57 : vector<4x8x1xf32> to vector<4x8x8xf32>
    %59 = arith.mulf %54, %58 : vector<4x8x8xf32>
    %60 = arith.truncf %59 : vector<4x8x8xf32> to vector<4x8x8xbf16>
    "tpu.trace_start"() <{level = 10 : i32, message = "hqk,hkd->hqd"}> : () -> ()
    %cst_23 = arith.constant dense<0.000000e+00> : vector<4x8x8xf32>
    %61 = tpu.matmul %60, %44, %cst_23 {dimension_numbers = #tpu.dot_dimension_numbers<[2], [1], [1], [2], [0, 0, 0, 1, 1, 2], [0], [0]>} : vector<4x8x8xbf16>, vector<4x8x8xbf16>, vector<4x8x8xf32> -> vector<4x8x8xf32>
    "tpu.trace_stop"() : () -> ()
    %62 = tpu.transpose %61, [1, 0, 2] : vector<4x8x8xf32> -> vector<8x4x8xf32>
    %63 = vector.shape_cast %62 : vector<8x4x8xf32> to vector<8x32xf32>
    %c0_24 = arith.constant 0 : index
    %c0_25 = arith.constant 0 : index
    %c0_26 = arith.constant 0 : index
    %64 = vector.load %arg7[%c0_24, %c0_25, %c0_26] : memref<2x32x32xbf16, #tpu.memory_space<vmem>>, vector<1x32x32xbf16>
    %65 = vector.shape_cast %64 : vector<1x32x32xbf16> to vector<32x32xbf16>
    %66 = arith.truncf %63 : vector<8x32xf32> to vector<8x32xbf16>
    %cst_27 = arith.constant dense<0.000000e+00> : vector<8x32xf32>
    %67 = tpu.matmul %66, %65, %cst_27 {dimension_numbers = #tpu.dot_dimension_numbers<[1], [0], [0], [1], [0, 0, 1, 1], [], []>} : vector<8x32xbf16>, vector<32x32xbf16>, vector<8x32xf32> -> vector<8x32xf32>
    %c0_28 = arith.constant 0 : index
    %c0_29 = arith.constant 0 : index
    %c0_30 = arith.constant 0 : index
    %68 = vector.load %arg8[%c0_28, %c0_29, %c0_30] : memref<2x1x32xf32, #tpu.memory_space<vmem>>, vector<1x1x32xf32>
    %69 = vector.shape_cast %68 : vector<1x1x32xf32> to vector<1x32xf32>
    %70 = vector.broadcast %69 : vector<1x32xf32> to vector<8x32xf32>
    %71 = arith.addf %67, %70 : vector<8x32xf32>
    %72 = arith.addf %71, %25 : vector<8x32xf32>
    %c0_31 = arith.constant 0 : index
    %c0_32 = arith.constant 0 : index
    %c0_33 = arith.constant 0 : index
    %73 = vector.load %arg9[%c0_31, %c0_32, %c0_33] : memref<2x1x32xf32, #tpu.memory_space<vmem>>, vector<1x1x32xf32>
    %74 = vector.shape_cast %73 : vector<1x1x32xf32> to vector<1x32xf32>
    %c0_34 = arith.constant 0 : index
    %c0_35 = arith.constant 0 : index
    %c0_36 = arith.constant 0 : index
    %75 = vector.load %arg10[%c0_34, %c0_35, %c0_36] : memref<2x1x32xf32, #tpu.memory_space<vmem>>, vector<1x1x32xf32>
    %76 = vector.shape_cast %75 : vector<1x1x32xf32> to vector<1x32xf32>
    %cst_37 = arith.constant dense<0.000000e+00> : vector<8xf32>
    %77 = vector.multi_reduction <add>, %72, %cst_37 [1] : vector<8x32xf32> to vector<8xf32>
    %78 = vector.shape_cast %77 : vector<8xf32> to vector<8x1xf32>
    %cst_38 = arith.constant 3.200000e+01 : f32
    %79 = vector.broadcast %cst_38 : f32 to vector<8x1xf32>
    %80 = arith.divf %78, %79 : vector<8x1xf32>
    %81 = vector.broadcast %80 : vector<8x1xf32> to vector<8x32xf32>
    %82 = arith.subf %72, %81 : vector<8x32xf32>
    %83 = arith.mulf %82, %82 : vector<8x32xf32>
    %cst_39 = arith.constant dense<0.000000e+00> : vector<8xf32>
    %84 = vector.multi_reduction <add>, %83, %cst_39 [1] : vector<8x32xf32> to vector<8xf32>
    %85 = vector.shape_cast %84 : vector<8xf32> to vector<8x1xf32>
    %cst_40 = arith.constant 3.200000e+01 : f32
    %86 = vector.broadcast %cst_40 : f32 to vector<8x1xf32>
    %87 = arith.divf %85, %86 : vector<8x1xf32>
    %88 = vector.broadcast %80 : vector<8x1xf32> to vector<8x32xf32>
    %89 = arith.subf %72, %88 : vector<8x32xf32>
    %cst_41 = arith.constant 9.99999996E-13 : f32
    %90 = vector.broadcast %cst_41 : f32 to vector<8x1xf32>
    %91 = arith.addf %87, %90 : vector<8x1xf32>
    %92 = math.rsqrt %91 : vector<8x1xf32>
    %93 = vector.broadcast %92 : vector<8x1xf32> to vector<8x32xf32>
    %94 = arith.mulf %89, %93 : vector<8x32xf32>
    %95 = vector.broadcast %74 : vector<1x32xf32> to vector<8x32xf32>
    %96 = arith.mulf %94, %95 : vector<8x32xf32>
    %97 = vector.broadcast %76 : vector<1x32xf32> to vector<8x32xf32>
    %98 = arith.addf %96, %97 : vector<8x32xf32>
    %c0_42 = arith.constant 0 : index
    %c0_43 = arith.constant 0 : index
    %c0_44 = arith.constant 0 : index
    %99 = vector.load %arg11[%c0_42, %c0_43, %c0_44] : memref<2x32x128xbf16, #tpu.memory_space<vmem>>, vector<1x32x128xbf16>
    %100 = vector.shape_cast %99 : vector<1x32x128xbf16> to vector<32x128xbf16>
    %101 = arith.truncf %98 : vector<8x32xf32> to vector<8x32xbf16>
    %cst_45 = arith.constant dense<0.000000e+00> : vector<8x128xf32>
    %102 = tpu.matmul %101, %100, %cst_45 {dimension_numbers = #tpu.dot_dimension_numbers<[1], [0], [0], [1], [0, 0, 1, 1], [], []>} : vector<8x32xbf16>, vector<32x128xbf16>, vector<8x128xf32> -> vector<8x128xf32>
    %c0_46 = arith.constant 0 : index
    %c0_47 = arith.constant 0 : index
    %c0_48 = arith.constant 0 : index
    %103 = vector.load %arg12[%c0_46, %c0_47, %c0_48] : memref<2x1x128xf32, #tpu.memory_space<vmem>>, vector<1x1x128xf32>
    %104 = vector.shape_cast %103 : vector<1x1x128xf32> to vector<1x128xf32>
    %105 = vector.broadcast %104 : vector<1x128xf32> to vector<8x128xf32>
    %106 = arith.addf %102, %105 : vector<8x128xf32>
    %107 = arith.mulf %106, %106 : vector<8x128xf32>
    %108 = arith.mulf %106, %107 : vector<8x128xf32>
    %cst_49 = arith.constant 4.471500e-02 : f32
    %109 = vector.broadcast %cst_49 : f32 to vector<8x128xf32>
    %110 = arith.mulf %109, %108 : vector<8x128xf32>
    %111 = arith.addf %106, %110 : vector<8x128xf32>
    %cst_50 = arith.constant 0.797884583 : f32
    %112 = vector.broadcast %cst_50 : f32 to vector<8x128xf32>
    %113 = arith.mulf %112, %111 : vector<8x128xf32>
    %114 = math.tanh %113 : vector<8x128xf32>
    %cst_51 = arith.constant 1.000000e+00 : f32
    %115 = vector.broadcast %cst_51 : f32 to vector<8x128xf32>
    %116 = arith.addf %115, %114 : vector<8x128xf32>
    %cst_52 = arith.constant 5.000000e-01 : f32
    %117 = vector.broadcast %cst_52 : f32 to vector<8x128xf32>
    %118 = arith.mulf %117, %116 : vector<8x128xf32>
    %119 = arith.mulf %106, %118 : vector<8x128xf32>
    %c0_53 = arith.constant 0 : index
    %c0_54 = arith.constant 0 : index
    %c0_55 = arith.constant 0 : index
    %120 = vector.load %arg13[%c0_53, %c0_54, %c0_55] : memref<2x128x32xbf16, #tpu.memory_space<vmem>>, vector<1x128x32xbf16>
    %121 = vector.shape_cast %120 : vector<1x128x32xbf16> to vector<128x32xbf16>
    %122 = arith.truncf %119 : vector<8x128xf32> to vector<8x128xbf16>
    %cst_56 = arith.constant dense<0.000000e+00> : vector<8x32xf32>
    %123 = tpu.matmul %122, %121, %cst_56 {dimension_numbers = #tpu.dot_dimension_numbers<[1], [0], [0], [1], [0, 0, 1, 1], [], []>} : vector<8x128xbf16>, vector<128x32xbf16>, vector<8x32xf32> -> vector<8x32xf32>
    %c0_57 = arith.constant 0 : index
    %c0_58 = arith.constant 0 : index
    %c0_59 = arith.constant 0 : index
    %124 = vector.load %arg14[%c0_57, %c0_58, %c0_59] : memref<2x1x32xf32, #tpu.memory_space<vmem>>, vector<1x1x32xf32>
    %125 = vector.shape_cast %124 : vector<1x1x32xf32> to vector<1x32xf32>
    %126 = vector.broadcast %125 : vector<1x32xf32> to vector<8x32xf32>
    %127 = arith.addf %123, %126 : vector<8x32xf32>
    %128 = arith.addf %127, %98 : vector<8x32xf32>
    %c0_60 = arith.constant 0 : index
    %c0_61 = arith.constant 0 : index
    %c0_62 = arith.constant 0 : index
    %129 = vector.load %arg15[%c0_60, %c0_61, %c0_62] : memref<2x1x32xf32, #tpu.memory_space<vmem>>, vector<1x1x32xf32>
    %130 = vector.shape_cast %129 : vector<1x1x32xf32> to vector<1x32xf32>
    %c0_63 = arith.constant 0 : index
    %c0_64 = arith.constant 0 : index
    %c0_65 = arith.constant 0 : index
    %131 = vector.load %arg16[%c0_63, %c0_64, %c0_65] : memref<2x1x32xf32, #tpu.memory_space<vmem>>, vector<1x1x32xf32>
    %132 = vector.shape_cast %131 : vector<1x1x32xf32> to vector<1x32xf32>
    %cst_66 = arith.constant dense<0.000000e+00> : vector<8xf32>
    %133 = vector.multi_reduction <add>, %128, %cst_66 [1] : vector<8x32xf32> to vector<8xf32>
    %134 = vector.shape_cast %133 : vector<8xf32> to vector<8x1xf32>
    %cst_67 = arith.constant 3.200000e+01 : f32
    %135 = vector.broadcast %cst_67 : f32 to vector<8x1xf32>
    %136 = arith.divf %134, %135 : vector<8x1xf32>
    %137 = vector.broadcast %136 : vector<8x1xf32> to vector<8x32xf32>
    %138 = arith.subf %128, %137 : vector<8x32xf32>
    %139 = arith.mulf %138, %138 : vector<8x32xf32>
    %cst_68 = arith.constant dense<0.000000e+00> : vector<8xf32>
    %140 = vector.multi_reduction <add>, %139, %cst_68 [1] : vector<8x32xf32> to vector<8xf32>
    %141 = vector.shape_cast %140 : vector<8xf32> to vector<8x1xf32>
    %cst_69 = arith.constant 3.200000e+01 : f32
    %142 = vector.broadcast %cst_69 : f32 to vector<8x1xf32>
    %143 = arith.divf %141, %142 : vector<8x1xf32>
    %144 = vector.broadcast %136 : vector<8x1xf32> to vector<8x32xf32>
    %145 = arith.subf %128, %144 : vector<8x32xf32>
    %cst_70 = arith.constant 9.99999996E-13 : f32
    %146 = vector.broadcast %cst_70 : f32 to vector<8x1xf32>
    %147 = arith.addf %143, %146 : vector<8x1xf32>
    %148 = math.rsqrt %147 : vector<8x1xf32>
    %149 = vector.broadcast %148 : vector<8x1xf32> to vector<8x32xf32>
    %150 = arith.mulf %145, %149 : vector<8x32xf32>
    %151 = vector.broadcast %130 : vector<1x32xf32> to vector<8x32xf32>
    %152 = arith.mulf %150, %151 : vector<8x32xf32>
    %153 = vector.broadcast %132 : vector<1x32xf32> to vector<8x32xf32>
    %154 = arith.addf %152, %153 : vector<8x32xf32>
    %c1 = arith.constant 1 : index
    %c0_71 = arith.constant 0 : index
    %c0_72 = arith.constant 0 : index
    %155 = vector.load %arg5[%c1, %c0_71, %c0_72] : memref<2x32x128xbf16, #tpu.memory_space<vmem>>, vector<1x32x128xbf16>
    %156 = vector.shape_cast %155 : vector<1x32x128xbf16> to vector<32x128xbf16>
    %157 = arith.truncf %154 : vector<8x32xf32> to vector<8x32xbf16>
    %cst_73 = arith.constant dense<0.000000e+00> : vector<8x128xf32>
    %158 = tpu.matmul %157, %156, %cst_73 {dimension_numbers = #tpu.dot_dimension_numbers<[1], [0], [0], [1], [0, 0, 1, 1], [], []>} : vector<8x32xbf16>, vector<32x128xbf16>, vector<8x128xf32> -> vector<8x128xf32>
    %c1_74 = arith.constant 1 : index
    %c0_75 = arith.constant 0 : index
    %c0_76 = arith.constant 0 : index
    %159 = vector.load %arg6[%c1_74, %c0_75, %c0_76] : memref<2x1x128xf32, #tpu.memory_space<vmem>>, vector<1x1x128xf32>
    %160 = vector.shape_cast %159 : vector<1x1x128xf32> to vector<1x128xf32>
    %161 = vector.broadcast %160 : vector<1x128xf32> to vector<8x128xf32>
    %162 = arith.addf %158, %161 : vector<8x128xf32>
    %163 = arith.truncf %162 : vector<8x128xf32> to vector<8x128xbf16>
    %164 = vector.extract_strided_slice %163 {offsets = [0, 0], sizes = [8, 32], strides = [1, 1]} : vector<8x128xbf16> to vector<8x32xbf16>
    %165 = vector.extract_strided_slice %163 {offsets = [0, 32], sizes = [8, 32], strides = [1, 1]} : vector<8x128xbf16> to vector<8x32xbf16>
    %166 = vector.extract_strided_slice %163 {offsets = [0, 64], sizes = [8, 32], strides = [1, 1]} : vector<8x128xbf16> to vector<8x32xbf16>
    %167 = vector.shape_cast %164 : vector<8x32xbf16> to vector<8x4x8xbf16>
    %168 = tpu.transpose %167, [1, 0, 2] : vector<8x4x8xbf16> -> vector<4x8x8xbf16>
    %169 = vector.shape_cast %165 : vector<8x32xbf16> to vector<8x4x8xbf16>
    %170 = tpu.transpose %169, [1, 0, 2] : vector<8x4x8xbf16> -> vector<4x8x8xbf16>
    %171 = vector.shape_cast %166 : vector<8x32xbf16> to vector<8x4x8xbf16>
    %172 = tpu.transpose %171, [1, 0, 2] : vector<8x4x8xbf16> -> vector<4x8x8xbf16>
    "tpu.trace_start"() <{level = 10 : i32, message = "hqd,hkd->hqk"}> : () -> ()
    %cst_77 = arith.constant dense<0.000000e+00> : vector<4x8x8xf32>
    %173 = tpu.matmul %168, %170, %cst_77 {dimension_numbers = #tpu.dot_dimension_numbers<[2], [2], [1], [1], [0, 0, 0, 1, 1, 1], [0], [0]>} : vector<4x8x8xbf16>, vector<4x8x8xbf16>, vector<4x8x8xf32> -> vector<4x8x8xf32>
    "tpu.trace_stop"() : () -> ()
    %174 = vector.shape_cast %26 : vector<1x1x8xf32> to vector<1x8xf32>
    %175 = vector.shape_cast %174 : vector<1x8xf32> to vector<1x1x8xf32>
    %176 = vector.broadcast %175 : vector<1x1x8xf32> to vector<4x8x8xf32>
    %177 = arith.addf %173, %176 : vector<4x8x8xf32>
    %cst_78 = arith.constant dense<0xFF800000> : vector<4x8xf32>
    %178 = vector.multi_reduction <maximumf>, %177, %cst_78 [2] : vector<4x8x8xf32> to vector<4x8xf32>
    %179 = vector.shape_cast %178 : vector<4x8xf32> to vector<4x8x1xf32>
    %180 = vector.broadcast %179 : vector<4x8x1xf32> to vector<4x8x8xf32>
    %181 = arith.subf %177, %180 : vector<4x8x8xf32>
    %182 = math.exp %181 : vector<4x8x8xf32>
    %cst_79 = arith.constant dense<0.000000e+00> : vector<4x8xf32>
    %183 = vector.multi_reduction <add>, %182, %cst_79 [2] : vector<4x8x8xf32> to vector<4x8xf32>
    %184 = vector.shape_cast %183 : vector<4x8xf32> to vector<4x8x1xf32>
    %185 = tpu.reciprocal %184 {approx = true} : vector<4x8x1xf32> -> vector<4x8x1xf32>
    %186 = vector.broadcast %185 : vector<4x8x1xf32> to vector<4x8x8xf32>
    %187 = arith.mulf %182, %186 : vector<4x8x8xf32>
    %188 = arith.truncf %187 : vector<4x8x8xf32> to vector<4x8x8xbf16>
    "tpu.trace_start"() <{level = 10 : i32, message = "hqk,hkd->hqd"}> : () -> ()
    %cst_80 = arith.constant dense<0.000000e+00> : vector<4x8x8xf32>
    %189 = tpu.matmul %188, %172, %cst_80 {dimension_numbers = #tpu.dot_dimension_numbers<[2], [1], [1], [2], [0, 0, 0, 1, 1, 2], [0], [0]>} : vector<4x8x8xbf16>, vector<4x8x8xbf16>, vector<4x8x8xf32> -> vector<4x8x8xf32>
    "tpu.trace_stop"() : () -> ()
    %190 = tpu.transpose %189, [1, 0, 2] : vector<4x8x8xf32> -> vector<8x4x8xf32>
    %191 = vector.shape_cast %190 : vector<8x4x8xf32> to vector<8x32xf32>
    %c1_81 = arith.constant 1 : index
    %c0_82 = arith.constant 0 : index
    %c0_83 = arith.constant 0 : index
    %192 = vector.load %arg7[%c1_81, %c0_82, %c0_83] : memref<2x32x32xbf16, #tpu.memory_space<vmem>>, vector<1x32x32xbf16>
    %193 = vector.shape_cast %192 : vector<1x32x32xbf16> to vector<32x32xbf16>
    %194 = arith.truncf %191 : vector<8x32xf32> to vector<8x32xbf16>
    %cst_84 = arith.constant dense<0.000000e+00> : vector<8x32xf32>
    %195 = tpu.matmul %194, %193, %cst_84 {dimension_numbers = #tpu.dot_dimension_numbers<[1], [0], [0], [1], [0, 0, 1, 1], [], []>} : vector<8x32xbf16>, vector<32x32xbf16>, vector<8x32xf32> -> vector<8x32xf32>
    %c1_85 = arith.constant 1 : index
    %c0_86 = arith.constant 0 : index
    %c0_87 = arith.constant 0 : index
    %196 = vector.load %arg8[%c1_85, %c0_86, %c0_87] : memref<2x1x32xf32, #tpu.memory_space<vmem>>, vector<1x1x32xf32>
    %197 = vector.shape_cast %196 : vector<1x1x32xf32> to vector<1x32xf32>
    %198 = vector.broadcast %197 : vector<1x32xf32> to vector<8x32xf32>
    %199 = arith.addf %195, %198 : vector<8x32xf32>
    %200 = arith.addf %199, %154 : vector<8x32xf32>
    %c1_88 = arith.constant 1 : index
    %c0_89 = arith.constant 0 : index
    %c0_90 = arith.constant 0 : index
    %201 = vector.load %arg9[%c1_88, %c0_89, %c0_90] : memref<2x1x32xf32, #tpu.memory_space<vmem>>, vector<1x1x32xf32>
    %202 = vector.shape_cast %201 : vector<1x1x32xf32> to vector<1x32xf32>
    %c1_91 = arith.constant 1 : index
    %c0_92 = arith.constant 0 : index
    %c0_93 = arith.constant 0 : index
    %203 = vector.load %arg10[%c1_91, %c0_92, %c0_93] : memref<2x1x32xf32, #tpu.memory_space<vmem>>, vector<1x1x32xf32>
    %204 = vector.shape_cast %203 : vector<1x1x32xf32> to vector<1x32xf32>
    %cst_94 = arith.constant dense<0.000000e+00> : vector<8xf32>
    %205 = vector.multi_reduction <add>, %200, %cst_94 [1] : vector<8x32xf32> to vector<8xf32>
    %206 = vector.shape_cast %205 : vector<8xf32> to vector<8x1xf32>
    %cst_95 = arith.constant 3.200000e+01 : f32
    %207 = vector.broadcast %cst_95 : f32 to vector<8x1xf32>
    %208 = arith.divf %206, %207 : vector<8x1xf32>
    %209 = vector.broadcast %208 : vector<8x1xf32> to vector<8x32xf32>
    %210 = arith.subf %200, %209 : vector<8x32xf32>
    %211 = arith.mulf %210, %210 : vector<8x32xf32>
    %cst_96 = arith.constant dense<0.000000e+00> : vector<8xf32>
    %212 = vector.multi_reduction <add>, %211, %cst_96 [1] : vector<8x32xf32> to vector<8xf32>
    %213 = vector.shape_cast %212 : vector<8xf32> to vector<8x1xf32>
    %cst_97 = arith.constant 3.200000e+01 : f32
    %214 = vector.broadcast %cst_97 : f32 to vector<8x1xf32>
    %215 = arith.divf %213, %214 : vector<8x1xf32>
    %216 = vector.broadcast %208 : vector<8x1xf32> to vector<8x32xf32>
    %217 = arith.subf %200, %216 : vector<8x32xf32>
    %cst_98 = arith.constant 9.99999996E-13 : f32
    %218 = vector.broadcast %cst_98 : f32 to vector<8x1xf32>
    %219 = arith.addf %215, %218 : vector<8x1xf32>
    %220 = math.rsqrt %219 : vector<8x1xf32>
    %221 = vector.broadcast %220 : vector<8x1xf32> to vector<8x32xf32>
    %222 = arith.mulf %217, %221 : vector<8x32xf32>
    %223 = vector.broadcast %202 : vector<1x32xf32> to vector<8x32xf32>
    %224 = arith.mulf %222, %223 : vector<8x32xf32>
    %225 = vector.broadcast %204 : vector<1x32xf32> to vector<8x32xf32>
    %226 = arith.addf %224, %225 : vector<8x32xf32>
    %c1_99 = arith.constant 1 : index
    %c0_100 = arith.constant 0 : index
    %c0_101 = arith.constant 0 : index
    %227 = vector.load %arg11[%c1_99, %c0_100, %c0_101] : memref<2x32x128xbf16, #tpu.memory_space<vmem>>, vector<1x32x128xbf16>
    %228 = vector.shape_cast %227 : vector<1x32x128xbf16> to vector<32x128xbf16>
    %229 = arith.truncf %226 : vector<8x32xf32> to vector<8x32xbf16>
    %cst_102 = arith.constant dense<0.000000e+00> : vector<8x128xf32>
    %230 = tpu.matmul %229, %228, %cst_102 {dimension_numbers = #tpu.dot_dimension_numbers<[1], [0], [0], [1], [0, 0, 1, 1], [], []>} : vector<8x32xbf16>, vector<32x128xbf16>, vector<8x128xf32> -> vector<8x128xf32>
    %c1_103 = arith.constant 1 : index
    %c0_104 = arith.constant 0 : index
    %c0_105 = arith.constant 0 : index
    %231 = vector.load %arg12[%c1_103, %c0_104, %c0_105] : memref<2x1x128xf32, #tpu.memory_space<vmem>>, vector<1x1x128xf32>
    %232 = vector.shape_cast %231 : vector<1x1x128xf32> to vector<1x128xf32>
    %233 = vector.broadcast %232 : vector<1x128xf32> to vector<8x128xf32>
    %234 = arith.addf %230, %233 : vector<8x128xf32>
    %235 = arith.mulf %234, %234 : vector<8x128xf32>
    %236 = arith.mulf %234, %235 : vector<8x128xf32>
    %cst_106 = arith.constant 4.471500e-02 : f32
    %237 = vector.broadcast %cst_106 : f32 to vector<8x128xf32>
    %238 = arith.mulf %237, %236 : vector<8x128xf32>
    %239 = arith.addf %234, %238 : vector<8x128xf32>
    %cst_107 = arith.constant 0.797884583 : f32
    %240 = vector.broadcast %cst_107 : f32 to vector<8x128xf32>
    %241 = arith.mulf %240, %239 : vector<8x128xf32>
    %242 = math.tanh %241 : vector<8x128xf32>
    %cst_108 = arith.constant 1.000000e+00 : f32
    %243 = vector.broadcast %cst_108 : f32 to vector<8x128xf32>
    %244 = arith.addf %243, %242 : vector<8x128xf32>
    %cst_109 = arith.constant 5.000000e-01 : f32
    %245 = vector.broadcast %cst_109 : f32 to vector<8x128xf32>
    %246 = arith.mulf %245, %244 : vector<8x128xf32>
    %247 = arith.mulf %234, %246 : vector<8x128xf32>
    %c1_110 = arith.constant 1 : index
    %c0_111 = arith.constant 0 : index
    %c0_112 = arith.constant 0 : index
    %248 = vector.load %arg13[%c1_110, %c0_111, %c0_112] : memref<2x128x32xbf16, #tpu.memory_space<vmem>>, vector<1x128x32xbf16>
    %249 = vector.shape_cast %248 : vector<1x128x32xbf16> to vector<128x32xbf16>
    %250 = arith.truncf %247 : vector<8x128xf32> to vector<8x128xbf16>
    %cst_113 = arith.constant dense<0.000000e+00> : vector<8x32xf32>
    %251 = tpu.matmul %250, %249, %cst_113 {dimension_numbers = #tpu.dot_dimension_numbers<[1], [0], [0], [1], [0, 0, 1, 1], [], []>} : vector<8x128xbf16>, vector<128x32xbf16>, vector<8x32xf32> -> vector<8x32xf32>
    %c1_114 = arith.constant 1 : index
    %c0_115 = arith.constant 0 : index
    %c0_116 = arith.constant 0 : index
    %252 = vector.load %arg14[%c1_114, %c0_115, %c0_116] : memref<2x1x32xf32, #tpu.memory_space<vmem>>, vector<1x1x32xf32>
    %253 = vector.shape_cast %252 : vector<1x1x32xf32> to vector<1x32xf32>
    %254 = vector.broadcast %253 : vector<1x32xf32> to vector<8x32xf32>
    %255 = arith.addf %251, %254 : vector<8x32xf32>
    %256 = arith.addf %255, %226 : vector<8x32xf32>
    %c1_117 = arith.constant 1 : index
    %c0_118 = arith.constant 0 : index
    %c0_119 = arith.constant 0 : index
    %257 = vector.load %arg15[%c1_117, %c0_118, %c0_119] : memref<2x1x32xf32, #tpu.memory_space<vmem>>, vector<1x1x32xf32>
    %258 = vector.shape_cast %257 : vector<1x1x32xf32> to vector<1x32xf32>
    %c1_120 = arith.constant 1 : index
    %c0_121 = arith.constant 0 : index
    %c0_122 = arith.constant 0 : index
    %259 = vector.load %arg16[%c1_120, %c0_121, %c0_122] : memref<2x1x32xf32, #tpu.memory_space<vmem>>, vector<1x1x32xf32>
    %260 = vector.shape_cast %259 : vector<1x1x32xf32> to vector<1x32xf32>
    %cst_123 = arith.constant dense<0.000000e+00> : vector<8xf32>
    %261 = vector.multi_reduction <add>, %256, %cst_123 [1] : vector<8x32xf32> to vector<8xf32>
    %262 = vector.shape_cast %261 : vector<8xf32> to vector<8x1xf32>
    %cst_124 = arith.constant 3.200000e+01 : f32
    %263 = vector.broadcast %cst_124 : f32 to vector<8x1xf32>
    %264 = arith.divf %262, %263 : vector<8x1xf32>
    %265 = vector.broadcast %264 : vector<8x1xf32> to vector<8x32xf32>
    %266 = arith.subf %256, %265 : vector<8x32xf32>
    %267 = arith.mulf %266, %266 : vector<8x32xf32>
    %cst_125 = arith.constant dense<0.000000e+00> : vector<8xf32>
    %268 = vector.multi_reduction <add>, %267, %cst_125 [1] : vector<8x32xf32> to vector<8xf32>
    %269 = vector.shape_cast %268 : vector<8xf32> to vector<8x1xf32>
    %cst_126 = arith.constant 3.200000e+01 : f32
    %270 = vector.broadcast %cst_126 : f32 to vector<8x1xf32>
    %271 = arith.divf %269, %270 : vector<8x1xf32>
    %272 = vector.broadcast %264 : vector<8x1xf32> to vector<8x32xf32>
    %273 = arith.subf %256, %272 : vector<8x32xf32>
    %cst_127 = arith.constant 9.99999996E-13 : f32
    %274 = vector.broadcast %cst_127 : f32 to vector<8x1xf32>
    %275 = arith.addf %271, %274 : vector<8x1xf32>
    %276 = math.rsqrt %275 : vector<8x1xf32>
    %277 = vector.broadcast %276 : vector<8x1xf32> to vector<8x32xf32>
    %278 = arith.mulf %273, %277 : vector<8x32xf32>
    %279 = vector.broadcast %258 : vector<1x32xf32> to vector<8x32xf32>
    %280 = arith.mulf %278, %279 : vector<8x32xf32>
    %281 = vector.broadcast %260 : vector<1x32xf32> to vector<8x32xf32>
    %282 = arith.addf %280, %281 : vector<8x32xf32>
    %283 = vector.shape_cast %282 : vector<8x32xf32> to vector<1x8x32xf32>
    %284 = vector.extract_strided_slice %283 {offsets = [0, 0, 0], sizes = [1, 1, 32], strides = [1, 1, 1]} : vector<1x8x32xf32> to vector<1x1x32xf32>
    %285 = vector.shape_cast %284 : vector<1x1x32xf32> to vector<1x32xf32>
    %c0_128 = arith.constant 0 : index
    %c0_129 = arith.constant 0 : index
    %286 = vector.load %arg17[%c0_128, %c0_129] : memref<32x32xbf16, #tpu.memory_space<vmem>>, vector<32x32xbf16>
    %287 = arith.truncf %285 : vector<1x32xf32> to vector<1x32xbf16>
    %cst_130 = arith.constant dense<0.000000e+00> : vector<1x32xf32>
    %288 = tpu.matmul %287, %286, %cst_130 {dimension_numbers = #tpu.dot_dimension_numbers<[1], [0], [0], [1], [0, 0, 1, 1], [], []>} : vector<1x32xbf16>, vector<32x32xbf16>, vector<1x32xf32> -> vector<1x32xf32>
    %c0_131 = arith.constant 0 : index
    %c0_132 = arith.constant 0 : index
    %289 = vector.load %arg18[%c0_131, %c0_132] : memref<1x32xf32, #tpu.memory_space<vmem>>, vector<1x32xf32>
    %290 = arith.addf %288, %289 : vector<1x32xf32>
    %cst_133 = arith.constant 0.000000e+00 : f32
    %291 = vector.broadcast %cst_133 : f32 to vector<1x32xf32>
    %292 = arith.maximumf %290, %291 : vector<1x32xf32>
    %c0_134 = arith.constant 0 : index
    %c0_135 = arith.constant 0 : index
    %293 = vector.load %arg19[%c0_134, %c0_135] : memref<32x128xbf16, #tpu.memory_space<vmem>>, vector<32x128xbf16>
    %294 = arith.truncf %292 : vector<1x32xf32> to vector<1x32xbf16>
    %cst_136 = arith.constant dense<0.000000e+00> : vector<1x128xf32>
    %295 = tpu.matmul %294, %293, %cst_136 {dimension_numbers = #tpu.dot_dimension_numbers<[1], [0], [0], [1], [0, 0, 1, 1], [], []>} : vector<1x32xbf16>, vector<32x128xbf16>, vector<1x128xf32> -> vector<1x128xf32>
    %c0_137 = arith.constant 0 : index
    %c0_138 = arith.constant 0 : index
    %296 = vector.load %arg20[%c0_137, %c0_138] : memref<1x128xf32, #tpu.memory_space<vmem>>, vector<1x128xf32>
    %297 = arith.addf %295, %296 : vector<1x128xf32>
    %298 = vector.shape_cast %297 : vector<1x128xf32> to vector<1x1x128xf32>
    %c0_139 = arith.constant 0 : index
    %c0_140 = arith.constant 0 : index
    %c0_141 = arith.constant 0 : index
    %299 = vector.load %arg21[%c0_139, %c0_140, %c0_141] : memref<1x1x128xf32, #tpu.memory_space<vmem>>, vector<1x1x128xf32>
    tpu.vector_store %arg21[%c0_139, %c0_140, %c0_141], %298 {strides = array<i32>} : memref<1x1x128xf32, #tpu.memory_space<vmem>>, vector<1x1x128xf32>,
    return
  }
  func.func @transform_0(%arg0: i32) -> (i32, i32, i32) {
    %c0_i32 = arith.constant 0 : i32
    %c0_i32_0 = arith.constant 0 : i32
    %c0_i32_1 = arith.constant 0 : i32
    return %arg0, %c0_i32, %c0_i32_0 : i32, i32, i32
  }
  func.func @transform_1(%arg0: i32) -> (i32, i32, i32) {
    %c0_i32 = arith.constant 0 : i32
    %c0_i32_0 = arith.constant 0 : i32
    %c0_i32_1 = arith.constant 0 : i32
    return %arg0, %c0_i32, %c0_i32_0 : i32, i32, i32
  }
  func.func @transform_2(%arg0: i32) -> (i32, i32) {
    %c0_i32 = arith.constant 0 : i32
    %c0_i32_0 = arith.constant 0 : i32
    %c0_i32_1 = arith.constant 0 : i32
    return %c0_i32, %c0_i32_0 : i32, i32
  }
  func.func @transform_3(%arg0: i32) -> (i32, i32) {
    %c0_i32 = arith.constant 0 : i32
    %c0_i32_0 = arith.constant 0 : i32
    %c0_i32_1 = arith.constant 0 : i32
    return %c0_i32, %c0_i32_0 : i32, i32
  }
  func.func @transform_4(%arg0: i32) -> (i32, i32, i32) {
    %c0_i32 = arith.constant 0 : i32
    %c0_i32_0 = arith.constant 0 : i32
    %c0_i32_1 = arith.constant 0 : i32
    %c0_i32_2 = arith.constant 0 : i32
    return %c0_i32, %c0_i32_0, %c0_i32_1 : i32, i32, i32
  }
  func.func @transform_5(%arg0: i32) -> (i32, i32, i32) {
    %c0_i32 = arith.constant 0 : i32
    %c0_i32_0 = arith.constant 0 : i32
    %c0_i32_1 = arith.constant 0 : i32
    %c0_i32_2 = arith.constant 0 : i32
    return %c0_i32, %c0_i32_0, %c0_i32_1 : i32, i32, i32
  }
  func.func @transform_6(%arg0: i32) -> (i32, i32, i32) {
    %c0_i32 = arith.constant 0 : i32
    %c0_i32_0 = arith.constant 0 : i32
    %c0_i32_1 = arith.constant 0 : i32
    %c0_i32_2 = arith.constant 0 : i32
    return %c0_i32, %c0_i32_0, %c0_i32_1 : i32, i32, i32
  }
  func.func @transform_7(%arg0: i32) -> (i32, i32, i32) {
    %c0_i32 = arith.constant 0 : i32
    %c0_i32_0 = arith.constant 0 : i32
    %c0_i32_1 = arith.constant 0 : i32
    %c0_i32_2 = arith.constant 0 : i32
    return %c0_i32, %c0_i32_0, %c0_i32_1 : i32, i32, i32
  }
  func.func @transform_8(%arg0: i32) -> (i32, i32, i32) {
    %c0_i32 = arith.constant 0 : i32
    %c0_i32_0 = arith.constant 0 : i32
    %c0_i32_1 = arith.constant 0 : i32
    %c0_i32_2 = arith.constant 0 : i32
    return %c0_i32, %c0_i32_0, %c0_i32_1 : i32, i32, i32
  }
  func.func @transform_9(%arg0: i32) -> (i32, i32, i32) {
    %c0_i32 = arith.constant 0 : i32
    %c0_i32_0 = arith.constant 0 : i32
    %c0_i32_1 = arith.constant 0 : i32
    %c0_i32_2 = arith.constant 0 : i32
    return %c0_i32, %c0_i32_0, %c0_i32_1 : i32, i32, i32
  }
  func.func @transform_10(%arg0: i32) -> (i32, i32, i32) {
    %c0_i32 = arith.constant 0 : i32
    %c0_i32_0 = arith.constant 0 : i32
    %c0_i32_1 = arith.constant 0 : i32
    %c0_i32_2 = arith.constant 0 : i32
    return %c0_i32, %c0_i32_0, %c0_i32_1 : i32, i32, i32
  }
  func.func @transform_11(%arg0: i32) -> (i32, i32, i32) {
    %c0_i32 = arith.constant 0 : i32
    %c0_i32_0 = arith.constant 0 : i32
    %c0_i32_1 = arith.constant 0 : i32
    %c0_i32_2 = arith.constant 0 : i32
    return %c0_i32, %c0_i32_0, %c0_i32_1 : i32, i32, i32
  }
  func.func @transform_12(%arg0: i32) -> (i32, i32, i32) {
    %c0_i32 = arith.constant 0 : i32
    %c0_i32_0 = arith.constant 0 : i32
    %c0_i32_1 = arith.constant 0 : i32
    %c0_i32_2 = arith.constant 0 : i32
    return %c0_i32, %c0_i32_0, %c0_i32_1 : i32, i32, i32
  }
  func.func @transform_13(%arg0: i32) -> (i32, i32, i32) {
    %c0_i32 = arith.constant 0 : i32
    %c0_i32_0 = arith.constant 0 : i32
    %c0_i32_1 = arith.constant 0 : i32
    %c0_i32_2 = arith.constant 0 : i32
    return %c0_i32, %c0_i32_0, %c0_i32_1 : i32, i32, i32
  }
  func.func @transform_14(%arg0: i32) -> (i32, i32, i32) {
    %c0_i32 = arith.constant 0 : i32
    %c0_i32_0 = arith.constant 0 : i32
    %c0_i32_1 = arith.constant 0 : i32
    %c0_i32_2 = arith.constant 0 : i32
    return %c0_i32, %c0_i32_0, %c0_i32_1 : i32, i32, i32
  }
  func.func @transform_15(%arg0: i32) -> (i32, i32, i32) {
    %c0_i32 = arith.constant 0 : i32
    %c0_i32_0 = arith.constant 0 : i32
    %c0_i32_1 = arith.constant 0 : i32
    %c0_i32_2 = arith.constant 0 : i32
    return %c0_i32, %c0_i32_0, %c0_i32_1 : i32, i32, i32
  }
  func.func @transform_16(%arg0: i32) -> (i32, i32) {
    %c0_i32 = arith.constant 0 : i32
    %c0_i32_0 = arith.constant 0 : i32
    %c0_i32_1 = arith.constant 0 : i32
    return %c0_i32, %c0_i32_0 : i32, i32
  }
  func.func @transform_17(%arg0: i32) -> (i32, i32) {
    %c0_i32 = arith.constant 0 : i32
    %c0_i32_0 = arith.constant 0 : i32
    %c0_i32_1 = arith.constant 0 : i32
    return %c0_i32, %c0_i32_0 : i32, i32
  }
  func.func @transform_18(%arg0: i32) -> (i32, i32) {
    %c0_i32 = arith.constant 0 : i32
    %c0_i32_0 = arith.constant 0 : i32
    %c0_i32_1 = arith.constant 0 : i32
    return %c0_i32, %c0_i32_0 : i32, i32
  }
  func.func @transform_19(%arg0: i32) -> (i32, i32) {
    %c0_i32 = arith.constant 0 : i32
    %c0_i32_0 = arith.constant 0 : i32
    %c0_i32_1 = arith.constant 0 : i32
    return %c0_i32, %c0_i32_0 : i32, i32
  }
  func.func @transform_20(%arg0: i32) -> (i32, i32, i32) {
    %c0_i32 = arith.constant 0 : i32
    %c0_i32_0 = arith.constant 0 : i32
    %c0_i32_1 = arith.constant 0 : i32
    return %arg0, %c0_i32, %c0_i32_0 : i32, i32, i32
  }
}

</mosaic_0001>

<bundles_post_ra>
// kernel: distilbert_class_forward.1
= control target key start
LH: loop header
LB: loop body
LE: loop exit
PB: predicated region body
PF: predicated region fallthrough
CT: control target
= control target key end

     0   :  { %s5281_s0 = inlined_call_operand.vmem [shape: f32[2,8,32], index: 0, kind: input, shape index: {}]   ;;  %s5282_s1 = inlined_call_operand.vmem [shape: f32[2,1,8], index: 1, kind: input, shape index: {}]   ;;  %s5283_s2 = inlined_call_operand.vmem [shape: f32[1,32], index: 2, kind: input, shape index: {}]   ;;  %s5284_s3 = inlined_call_operand.vmem [shape: f32[1,32], index: 3, kind: input, shape index: {}]   ;;  %s5285_s4 = inlined_call_operand.vmem [shape: bf16[2,32,128], index: 4, kind: input, shape index: {}]   ;;  %s5286_s5 = inlined_call_operand.vmem [shape: f32[2,1,128], index: 5, kind: input, shape index: {}]   ;;  %s5287_s6 = inlined_call_operand.vmem [shape: bf16[2,32,32], index: 6, kind: input, shape index: {}]   ;;  %s5288_s7 = inlined_call_operand.vmem [shape: f32[2,1,32], index: 7, kind: input, shape index: {}]   ;;  %s5289_s8 = inlined_call_operand.vmem [shape: f32[2,1,32], index: 8, kind: input, shape index: {}]   ;;  %s5290_s9 = inlined_call_operand.vmem [shape: f32[2,1,32], index: 9, kind: input, shape index: {}]   ;;  %s5291_s10 = inlined_call_operand.vmem [shape: bf16[2,32,128], index: 10, kind: input, shape index: {}]   ;;  %s5292_s11 = inlined_call_operand.vmem [shape: f32[2,1,128], index: 11, kind: input, shape index: {}]   ;;  %s5293_s12 = inlined_call_operand.vmem [shape: bf16[2,128,32], index: 12, kind: input, shape index: {}]   ;;  %s5294_s13 = inlined_call_operand.vmem [shape: f32[2,1,32], index: 13, kind: input, shape index: {}]   ;;  %s5295_s14 = inlined_call_operand.vmem [shape: f32[2,1,32], index: 14, kind: input, shape index: {}]   ;;  %s5296_s15 = inlined_call_operand.vmem [shape: f32[2,1,32], index: 15, kind: input, shape index: {}]   ;;  %s5297_s16 = inlined_call_operand.vmem [shape: bf16[32,32], index: 16, kind: input, shape index: {}]   ;;  %s5298_s17 = inlined_call_operand.vmem [shape: f32[1,32], index: 17, kind: input, shape index: {}]   ;;  %s5299_s18 = inlined_call_operand.vmem [shape: bf16[32,128], index: 18, kind: input, shape index: {}]   ;;  %s5300_s19 = inlined_call_operand.vmem [shape: f32[1,128], index: 19, kind: input, shape index: {}]   ;;  %s5301_s20 = inlined_call_operand.hbm [shape: f32[2,1,128], index: 20, kind: output, shape index: {}]  }
   0x1   :  { %5318 = sst [smem:[#allocation9_spill]] %s5281_s0 }
   0x2   :  { %5319 = sst [smem:[#allocation10_spill]] %s5282_s1 }
   0x3   :  { %5320 = sst [smem:[#allocation11_spill]] %s5283_s2 }
   0x4   :  { %5321 = sst [smem:[#allocation12_spill]] %s5284_s3 }
   0x5   :  { %5322 = sst [smem:[#allocation13_spill]] %s5285_s4 }
   0x6   :  { %25 = vsyncpa [#allocation3], 0 }
   0x7   :  { %27 = vsyncpa [#allocation3 + $0x1], 0  ;;  %s4522_s1 = smov 0   ;;  %s4524_s22 = smov 0  }
   0x8   :  { %s4526_s23 = smov 0   ;;  %s4528_s24 = smov 0  }
   0x9 LB: > { %5323 = sst [smem:[#allocation5_spill]] %s4397_s23  ;;  %s4543_s2 = sadd.s32 4294967295, %s4401_s24   ;;  %s4401_s24 = sphi %s4528_s24, %s5343_s24   ;;  %s4397_s23 = sphi %s4526_s23, %s5345_s23   ;;  %s4393_s22 = sphi %s4524_s22, %s5347_s22   ;;  %s4389_s1 = sphi %s4522_s1, %s5346_s1  }
   0xa   : > { %s3811_s25 = sadd.s32 4294967294, %s4401_s24   ;;  %s4547_s3 = sadd.s32 1, %s4401_s24  }
   0xb   : > { %5324 = sst [smem:[#allocation6_spill]] %s4547_s3  ;;  %s470_s26 = sadd.s32 1, %s4397_s23 }
   0xc   : > { %s467_s27 = ssub.s32 %s4401_s24, %s4547_s3  ;;  %p480_p0 = scmp.ne.s32.totalorder %s4397_s23, %s4393_s22 }
   0xd   : > { %p468_p1 = scmp.eq.s32.totalorder %s467_s27, 0  ;;  %p481_p2 = scmp.eq.s32.totalorder %s4543_s2, 1 }
   0xe   : > { %p486_p3 = scmp.ne.s32.totalorder %s4393_s22, %s4389_s1  ;;  %p487_p4 = scmp.eq.s32.totalorder %s3811_s25, 1 }
   0xf   : > { %s4558_s28 = scalar_select %p468_p1, %s4397_s23, %s470_s26  }
  0x10   : > { %p4560_p5 = por %p481_p2, %p480_p0  ;;  %p4564_p6 = por %p487_p4, %p486_p3 }
  0x11   : > { %5325 = sst [smem:[#allocation7_spill]] %s4558_s28  ;;  %p3814_p7 = scmp.ge.s32.totalorder %s4401_s24, 1 }
  0x12   : > { %s5327_s29 = scalar_select %p4564_p6, 1, 0 }
  0x13   : > { %p572_p8 = scmp.lt.s32.totalorder %s4401_s24, 3 }
  0x14   : > { %5328 = sst [smem:[#allocation8_spill]] %s5327_s29 }
  0x15   : > { %p573_p9 = pnand %p3814_p7, %p572_p8 }
  0x16   : > { %p631_p10 = scmp.lt.s32.totalorder (!%p573_p9), %s4543_s2, 1  ;;  %vm642_vm0 = vcmask (!%p573_p9), 261120   ;;  %s5329_s26 = sld [smem:[#allocation9_spill]] (!%p573_p9)  ;;  %v4403_v8 = vmov (!%p573_p9), 0.0   ;;  %vm4404_vm1 = vmmov (!%p573_p9), 0   ;;  %v750_v32 = vlaneseq (!%p573_p9) }
  0x17   : > { %576 = sbr.rel (%p573_p9) target bundleno = 6254 (0x186e), region = 100  ;;  %s5330_s3 = sld [smem:[#allocation13_spill]] (!%p573_p9)  ;;  %4008 = vmatprep.subr.bf16.mxu1 (!%p573_p9), %v4403_v8  ;;  %4022 = vmatprep.subr.bf16.mxu0 (!%p573_p9), %v4403_v8  ;;  %v3818_v20 = vld [vmem:[%s5286_s5] ss:$0 sm:$0xff] (!%p573_p9)  ;;  %v4409_v30 = vmov (!%p573_p9), 1983009808  }
  0x18   : > { %4012 = vmatprep.mubr.msk.bf16.mxu1 (!%p573_p9), %vm4404_vm1, %v4403_v8  ;;  %4024 = vmatprep.mubr.msk.bf16.mxu0 (!%p573_p9), %vm4404_vm1, %v4403_v8  ;;  %s5331_s25 = sld [smem:[#allocation11_spill]] (!%p573_p9)  ;;  %s5314_s23 = smov (!%p573_p9), 104   ;;  %v748_v31 = vunpack.c.l.s4 (!%p573_p9), %v4409_v30  ;;  %v751_v34 = vshrl.u32 (!%p573_p9), %v750_v32, 7  ;;  %v4410_v35 = vmov (!%p573_p9), 1934713408   ;;  %v4411_v57 = vmov (!%p573_p9), 0  }
  0x19   : > { %s5315_s28 = smov (!%p573_p9), 120   ;;  %s5312_s29 = smov (!%p573_p9), 96   ;;  %v765_v36 = vunpack.c.l.s4 (!%p573_p9), %v4410_v35  ;;  %vm1254_vm2 = vcmask (!%p573_p9), 64512   ;;  %vm1490_vm3 = vcmask (!%p573_p9), 1043456   ;;  %vm1821_vm4 = vcmask (!%p573_p9), 130048  }
  0x1a   : > { %v749_v33 = vunpack.c.0.s8 (!%p573_p9), %v748_v31  ;;  %vm1823_vm5 = vcmask (!%p573_p9), 195584  }
  0x1b   : > { %v766_v40 = vunpack.c.0.s8 (!%p573_p9), %v765_v36 }
  0x1c   : > { %v4632_v37 = vsub.s32 (!%p573_p9), %v749_v33, %v751_v34 }
  0x1d   : > { %v4260_v7 = vld [vmem:[%s5330_s3] sm:$0xff] (!%p573_p9)   ;;  %v4261_v9 = vld [vmem:[%s5330_s3 + $0x8] sm:$0xff] (!%p573_p9)   ;;  %v4642_v46 = vsub.s32 (!%p573_p9), %v766_v40, %v751_v34 }
  0x1e   : > { %s4572_s30 = scalar_select %p631_p10, %s4543_s2, 1  ;;  %4009 = vmatpush3.bf16.msra.mxu1 %v4260_v7  ;;  %v3816_v14 = vld [vmem:[%s5331_s25] ss:$0 sm:$0xff] }
  0x1f   : > { %4010 = vmatprep.subr.bf16.mxu1 %v4403_v8  ;;  %s5316_s25 = smov 112  }
  0x20   : > { %s3815_s0 = sshll.u32 %s4572_s30, 3 }
  0x21   : > { %s634_s27 = scalar_lea.vmem %s5329_s26, %s3815_s0  ;;  %s5332_s0 = sld [smem:[#allocation12_spill]] }
  0x22   : > { %v639_v0 = vld [vmem:[%s634_s27] sm:$0xff]  ;;  %4011 = vmatpush3.bf16.msra.mxu1 %v4261_v9  ;;  %s5309_s26 = smov 8   ;;  %s5310_s27 = smov 24  }
  0x23   : > { %v643_v1 = vsel %vm642_vm0, %v639_v0, 0.0  ;;  %4016 = vmatprep.subr.bf16.mxu1 %v4403_v8 }
  0x24   : > { %644 = vadd.xlane.f32.xlu0 %v643_v1 }
  0x27   : > { %v3817_v16 = vld [vmem:[%s5332_s0] ss:$0 sm:$0xff]  ;;  %s5333_s0 = sld [smem:[#allocation10_spill]] }
  0x2d   : > { %s4724_s21 = scalar_lea.vmem %s5333_s0, %s4572_s30  ;;  %s5307_s30 = smov 64  }
  0x2e   : > { %s5337_s0 = smov 96  }
  0xb1   : > { %v645_v2 = vpop.xlane.xlu0 %644 }
  0xb2   : > { %v647_v3 = vmul.f32 0.03125, %v645_v2 }
  0xb4   : > { %v648_v4 = vsub.f32 %v639_v0, %v647_v3 }
  0xb6   : > { %v649_v5 = vmul.f32 %v648_v4, %v648_v4 }
  0xb8   : > { %v650_v6 = vsel %vm642_vm0, %v649_v5, 0.0 }
  0xb9   : > { %651 = vadd.xlane.f32.xlu0 %v650_v6 }
 0x146   : > { %v652_v10 = vpop.xlane.xlu0 %651 }
 0x147   : > { %v653_v11 = vmul.f32 0.03125, %v652_v10 }
 0x149   : > { %v654_v12 = vadd.f32 1e-12, %v653_v11 }
 0x14b   : > { %4292 = vrsqrt.f32 %v654_v12 }
 0x155   : > { %v4293_v13 = vpop.eup %4292 }
 0x156   : > { %v656_v15 = vmul.f32 %v4293_v13, %v648_v4 }
 0x158   : > { %v663_v17 = vmul.f32 %v3816_v14, %v656_v15 }
 0x15a   : > { %v4600_v18 = vadd.f32 %v3817_v16, %v663_v17 }
 0x15c   : > { %v676_v19 = vpack.c.bf16 %v4600_v18, %v4600_v18 }
 0x15e   : > { %4013 = vmatmul.mubr.msk.bf16.vlgmr.msra.gmra.mrb[0].mxu1 %vm642_vm0, %v676_v19 }
 0x15f   : > { %4018 = vmatprep.mubr.msk.bf16.mxu1 %vm4404_vm1, %v4403_v8 }
 0x231   : > { %v733_v21 = vpop.f32.mrb[0].mxu1 }
 0x232   : > { %v734_v22 = vadd.f32 %v3818_v20, %v733_v21  ;;  %v4014_v23 = vpop.f32.mrb[1].mxu1 }
 0x233   : > { %v736_v24 = vpop.f32.mrb[2].mxu1 }
 0x234   : > { %v4610_v25 = vpack.c.bf16 %v734_v22, %v734_v22  ;;  %v4015_v26 = vpop.f32.mrb[3].mxu1 }
 0x236   : > { %745 = vrot.lane.b32.xlu0 %v4610_v25, %s5314_s23  ;;  %741 = vrot.lane.b32.xlu1 %v4610_v25, %s5315_s28  ;;  %v753_v43 = vrot.slane %v4610_v25, %v4632_v37  ;;  %s5334_s28 = smov 112   ;;  %s5338_s23 = smov 64  }
 0x23a   : > { %743 = vrot.lane.b32.xlu1 %v4610_v25, %s5316_s25  ;;  %s5335_s25 = smov 120  }
 0x23e   : > { %908 = vrot.lane.b32.xlu1 %v4610_v25, %s5312_s29 }
 0x2a8   : > { %v4620_v27 = vpop.permute.xlu1 %741  ;;  %v4628_v29 = vpop.permute.xlu0 %745 }
 0x2a9   : > { %910 = vrot.lane.b32.xlu1 %v4620_v27, %s5312_s29  ;;  %v795_v39 = vrot.slane %v4628_v29, %v4632_v37  ;;  %v787_v41 = vrot.slane %v4620_v27, %v4632_v37 }
 0x2ab   : > { %v796_v47 = vcombine.low %v787_v41, %v795_v39  ;;  %v797_v49 = vcombine.high %v787_v41, %v795_v39 }
 0x2ac   : > { %v4624_v28 = vpop.permute.xlu1 %743 }
 0x2ad   : > { %912 = vrot.lane.b32.xlu1 %v4624_v28, %s5312_s29  ;;  %v761_v38 = vrot.slane %v4624_v28, %v4632_v37  ;;  %v4651_v52 = vrot.slane %v796_v47, %v4642_v46  ;;  %v4654_v54 = vrot.slane %v797_v49, %v4642_v46 }
 0x2af   : > { %v762_v44 = vcombine.low %v753_v43, %v761_v38  ;;  %v763_v45 = vcombine.high %v753_v43, %v761_v38  ;;  %v812_v62 = vcombine.high %v4651_v52, %v4411_v57  ;;  %v813_v0 = vcombine.high %v4654_v54, %v4411_v57 }
 0x2b0   : > { %v909_v42 = vpop.permute.xlu1 %908  ;;  %v819_v6 = vshrl.u32 %v4651_v52, 16  ;;  %v835_v12 = vshrl.u32 %v4654_v54, 16 }
 0x2b1   : > { %914 = vrot.lane.b32.xlu1 %v4628_v29, %s5312_s29  ;;  %v4645_v50 = vrot.slane %v762_v44, %v4642_v46  ;;  %v4648_v51 = vrot.slane %v763_v45, %v4642_v46  ;;  %v923_v55 = vrot.slane %v909_v42, %v4632_v37  ;;  %v827_v11 = vshrl.u32 %v812_v62, 16 }
 0x2b2   : > { %v843_v15 = vshrl.u32 %v813_v0, 16 }
 0x2b3   : > { %v778_v58 = vcombine.high %v4645_v50, %v4411_v57  ;;  %v779_v59 = vcombine.high %v4648_v51, %v4411_v57  ;;  %v818_v1 = vshrl.u32 %v4645_v50, 16  ;;  %v834_v4 = vshrl.u32 %v4648_v51, 16 }
 0x2b5   : > { %v826_v7 = vshrl.u32 %v778_v58, 16  ;;  %v842_v9 = vshrl.u32 %v779_v59, 16  ;;  %v820_v16 = vpack.i.b16 %v819_v6, %v818_v1  ;;  %v824_v17 = vpack.i.b16 %v812_v62, %v778_v58 }
 0x2b6   : > { %v836_v20 = vpack.i.b16 %v835_v12, %v834_v4  ;;  %v840_v21 = vpack.i.b16 %v813_v0, %v779_v59 }
 0x2b7   : > { %v828_v24 = vpack.i.b16 %v827_v11, %v826_v7  ;;  %v844_v26 = vpack.i.b16 %v843_v15, %v842_v9 }
 0x2b8   : > { %v854_v62 = vcombine.low %v824_v17, %v840_v21  ;;  %v871_v1 = vcombine.low %v820_v16, %v836_v20 }
 0x2b9   : > { %v879_v59 = vcombine.low %v828_v24, %v844_v26 }
 0x31b   : > { %v911_v48 = vpop.permute.xlu1 %910 }
 0x31c   : > { %v957_v5 = vrot.slane %v911_v48, %v4632_v37 }
 0x31f   : > { %v913_v53 = vpop.permute.xlu1 %912 }
 0x320   : > { %v931_v56 = vrot.slane %v913_v53, %v4632_v37  ;;  %v816_v53 = vpack.i.b16 %v4651_v52, %v4645_v50  ;;  %v861_v52 = vrot.slane %v854_v62, %v4632_v37 }
 0x322   : > { %v932_v60 = vcombine.low %v923_v55, %v931_v56  ;;  %v933_v61 = vcombine.high %v923_v55, %v931_v56  ;;  %v832_v55 = vpack.i.b16 %v4654_v54, %v4648_v51  ;;  %v878_v54 = vrot.slane %v871_v1, %v4632_v37 }
 0x323   : > { %v915_v63 = vpop.permute.xlu1 %914 }
 0x324   : > { %v940_v2 = vrot.slane %v932_v60, %v4642_v46  ;;  %v965_v3 = vrot.slane %v915_v63, %v4632_v37  ;;  %v947_v10 = vrot.slane %v933_v61, %v4642_v46 }
 0x326   : > { %v966_v13 = vcombine.low %v957_v5, %v965_v3  ;;  %v967_v14 = vcombine.high %v957_v5, %v965_v3  ;;  %v948_v19 = vcombine.high %v940_v2, %v4411_v57  ;;  %v949_v30 = vcombine.high %v947_v10, %v4411_v57 }
 0x327   : > { %v988_v31 = vshrl.u32 %v940_v2, 16  ;;  %v1004_v38 = vshrl.u32 %v947_v10, 16  ;;  %v846_v3 = vcombine.low %v816_v53, %v832_v55  ;;  %v886_v5 = vrot.slane %v879_v59, %v4632_v37 }
 0x328   : > { %v974_v22 = vrot.slane %v966_v13, %v4642_v46  ;;  %v981_v23 = vrot.slane %v967_v14, %v4642_v46  ;;  %v996_v36 = vshrl.u32 %v948_v19, 16  ;;  %v1012_v45 = vshrl.u32 %v949_v30, 16 }
 0x329   : > { %v853_v9 = vrot.slane %v846_v3, %v4632_v37  ;;  %v887_v11 = vcombine.low %v878_v54, %v886_v5 }
 0x32a   : > { %v982_v32 = vcombine.high %v974_v22, %v4411_v57  ;;  %v983_v33 = vcombine.high %v981_v23, %v4411_v57  ;;  %v986_v34 = vpack.i.b16 %v974_v22, %v940_v2  ;;  %v989_v35 = vshrl.u32 %v974_v22, 16 }
 0x32b   : > { %v1002_v39 = vpack.i.b16 %v981_v23, %v947_v10  ;;  %v1005_v40 = vshrl.u32 %v981_v23, 16  ;;  %v862_v12 = vcombine.low %v853_v9, %v861_v52  ;;  %v894_v20 = vrot.slane %v887_v11, %v4642_v46 }
 0x32c   : > { %v990_v41 = vpack.i.b16 %v989_v35, %v988_v31  ;;  %v994_v42 = vpack.i.b16 %v982_v32, %v948_v19  ;;  %v997_v43 = vshrl.u32 %v982_v32, 16  ;;  %v1010_v44 = vpack.i.b16 %v983_v33, %v949_v30 }
 0x32d   : > { %v1006_v47 = vpack.i.b16 %v1005_v40, %v1004_v38  ;;  %v1013_v48 = vshrl.u32 %v983_v33, 16  ;;  %v1016_v49 = vcombine.low %v986_v34, %v1002_v39  ;;  %v869_v23 = vrot.slane %v862_v12, %v4642_v46 }
 0x32e   : > { %v998_v56 = vpack.i.b16 %v997_v43, %v996_v36  ;;  %v1024_v58 = vcombine.low %v994_v42, %v1010_v44  ;;  %v900_v30 = vshrl.u32 %v894_v20, 16  ;;  %v895_v38 = vcombine.high %v894_v20, %v4411_v57 }
 0x32f   : > { %v1014_v60 = vpack.i.b16 %v1013_v48, %v1012_v45  ;;  %v1041_v61 = vcombine.low %v990_v41, %v1006_v47  ;;  %v1023_v63 = vrot.slane %v1016_v49, %v4632_v37  ;;  %v898_v32 = vpack.i.b16 %v894_v20, %v869_v23  ;;  %v4727_v45 = vld [vmem:[%s4724_s21] ss:$0 sm:$0xff] }
 0x330   : > { %v1031_v0 = vrot.slane %v1024_v58, %v4632_v37  ;;  %v899_v33 = vshrl.u32 %v869_v23, 16  ;;  %v870_v40 = vcombine.high %v869_v23, %v4411_v57  ;;  %v906_v41 = vshrl.u32 %v895_v38, 16 }
 0x331   : > { %v1049_v2 = vcombine.low %v998_v56, %v1014_v60  ;;  %v1048_v50 = vrot.slane %v1041_v61, %v4632_v37 }
 0x332   : > { %v1032_v4 = vcombine.low %v1023_v63, %v1031_v0  ;;  %v901_v36 = vpack.i.b16 %v900_v30, %v899_v33  ;;  %v904_v42 = vpack.i.b16 %v895_v38, %v870_v40  ;;  %v905_v43 = vshrl.u32 %v870_v40, 16 }
 0x333   : > { %v1056_v51 = vrot.slane %v1049_v2, %v4632_v37 }
 0x334   : > { %v1039_v6 = vrot.slane %v1032_v4, %v4642_v46  ;;  %v907_v44 = vpack.i.b16 %v906_v41, %v905_v43 }
 0x335   : > { %v1057_v7 = vcombine.low %v1048_v50, %v1056_v51 }
 0x336   : > { %v1069_v14 = vshrl.u32 %v1039_v6, 16  ;;  %v1040_v21 = vcombine.high %v1039_v6, %v4411_v57 }
 0x337   : > { %v1064_v10 = vrot.slane %v1057_v7, %v4642_v46 }
 0x338   : > { %v1075_v31 = vshrl.u32 %v1040_v21, 16 }
 0x339   : > { %v1068_v13 = vpack.i.b16 %v1064_v10, %v1039_v6  ;;  %v1070_v15 = vshrl.u32 %v1064_v10, 16  ;;  %v1065_v16 = vcombine.high %v1064_v10, %v4411_v57 }
 0x33b   : > { %v1259_v17 = vsel %vm1254_vm2, %v1068_v13, 0  ;;  %v1071_v19 = vpack.i.b16 %v1070_v15, %v1069_v14  ;;  %v1076_v24 = vshrl.u32 %v1065_v16, 16  ;;  %v1074_v26 = vpack.i.b16 %v1065_v16, %v1040_v21 }
 0x33c   : > { %4017 = vmatpush3.bf16.xpose.msra.mxu1 %v1259_v17 }
 0x33d   : > { %v1305_v22 = vsel %vm1254_vm2, %v1071_v19, 0  ;;  %4028 = vmatprep.subr.bf16.mxu1 %v4403_v8  ;;  %v1077_v34 = vpack.i.b16 %v1076_v24, %v1075_v31  ;;  %v1351_v35 = vsel %vm1254_vm2, %v1074_v26, 0 }
 0x33e   : > { %4023 = vmatpush3.bf16.xpose.msra.mxu0 %v1305_v22 }
 0x33f   : > { %4034 = vmatprep.subr.bf16.mxu0 %v4403_v8  ;;  %v1397_v39 = vsel %vm1254_vm2, %v1077_v34, 0 }
 0x343   : > { %4019 = vmatmul.mubr.msk.bf16.vlgmr.msra.gmra.mrb[4].mxu1 %vm1254_vm2, %v898_v32 }
 0x344   : > { %4029 = vmatpush3.bf16.xpose.msra.mxu1 %v1351_v35  ;;  %4030 = vmatprep.mubr.msk.bf16.mxu1 %vm4404_vm1, %v4403_v8 }
 0x345   : > { %4025 = vmatmul.mubr.msk.bf16.vlgmr.msra.gmra.mrb[0].mxu0 %vm1254_vm2, %v901_v36  ;;  %4040 = vmatprep.subr.bf16.mxu1 %v4403_v8 }
 0x346   : > { %4035 = vmatpush3.bf16.xpose.msra.mxu0 %v1397_v39  ;;  %4036 = vmatprep.mubr.msk.bf16.mxu0 %vm4404_vm1, %v4403_v8 }
 0x347   : > { %4046 = vmatprep.subr.bf16.mxu0 %v4403_v8 }
 0x34b   : > { %4031 = vmatmul.mubr.msk.bf16.vlgmr.msra.gmra.mrb[8].mxu1 %vm1254_vm2, %v904_v42 }
 0x34c   : > { %4042 = vmatprep.mubr.msk.bf16.mxu1 %vm4404_vm1, %v4403_v8 }
 0x34d   : > { %4037 = vmatmul.mubr.msk.bf16.vlgmr.msra.gmra.mrb[4].mxu0 %vm1254_vm2, %v907_v44 }
 0x34e   : > { %4048 = vmatprep.mubr.msk.bf16.mxu0 %vm4404_vm1, %v4403_v8 }
 0x416   : > { %v1295_v47 = vpop.f32.mrb[4].mxu1 }
 0x417   : > { %v1296_v48 = vadd.f32 %v4727_v45, %v1295_v47  ;;  %v4020_v49 = vpop.f32.mrb[5].mxu1 }
 0x418   : > { %v1298_v53 = vpop.f32.mrb[6].mxu1  ;;  %v1341_v55 = vpop.f32.mrb[0].mxu0 }
 0x419   : > { %v1342_v56 = vadd.f32 %v4727_v45, %v1341_v55  ;;  %v4021_v58 = vpop.f32.mrb[7].mxu1  ;;  %v4026_v59 = vpop.f32.mrb[1].mxu0  ;;  %v1439_v60 = vsel %vm1254_vm2, %v1296_v48, -inf }
 0x41a   : > { %v1344_v61 = vpop.f32.mrb[2].mxu0  ;;  %1440 = vmax.xlane.f32.xlu1 %v1439_v60 }
 0x41b   : > { %v4027_v62 = vpop.f32.mrb[3].mxu0  ;;  %v1442_v63 = vsel %vm1254_vm2, %v1342_v56, -inf }
 0x41c   : > { %1443 = vmax.xlane.f32.xlu0 %v1442_v63 }
 0x41e   : > { %v1387_v0 = vpop.f32.mrb[8].mxu1 }
 0x41f   : > { %v1388_v1 = vadd.f32 %v4727_v45, %v1387_v0  ;;  %v4032_v2 = vpop.f32.mrb[9].mxu1 }
 0x420   : > { %v1390_v3 = vpop.f32.mrb[10].mxu1  ;;  %v1433_v4 = vpop.f32.mrb[4].mxu0 }
 0x421   : > { %v1434_v5 = vadd.f32 %v4727_v45, %v1433_v4  ;;  %v4033_v50 = vpop.f32.mrb[11].mxu1  ;;  %v4038_v51 = vpop.f32.mrb[5].mxu0  ;;  %v1445_v52 = vsel %vm1254_vm2, %v1388_v1, -inf }
 0x422   : > { %v1436_v54 = vpop.f32.mrb[6].mxu0  ;;  %1446 = vmax.xlane.f32.xlu1 %v1445_v52 }
 0x423   : > { %v4039_v6 = vpop.f32.mrb[7].mxu0  ;;  %v1448_v7 = vsel %vm1254_vm2, %v1434_v5, -inf }
 0x424   : > { %1449 = vmax.xlane.f32.xlu0 %v1448_v7 }
 0x433   : > { %1078 = vrot.lane.b32.xlu1 %v4610_v25, %s5307_s30 }
 0x4a7   : > { %v1441_v9 = vpop.xlane.xlu1 %1440 }
 0x4a8   : > { %v1451_v10 = vsub.f32 %v1296_v48, %v1441_v9 }
 0x4a9   : > { %v1444_v11 = vpop.xlane.xlu0 %1443 }
 0x4aa   : > { %v1455_v12 = vmul.f32 1.442695, %v1451_v10  ;;  %v1452_v13 = vsub.f32 %v1342_v56, %v1444_v11 }
 0x4ac   : > { %4294 = vpow2.f32 %v1455_v12  ;;  %v1457_v14 = vmul.f32 1.442695, %v1452_v13 }
 0x4ae   : > { %4296 = vpow2.f32 %v1457_v14 }
 0x4af   : > { %v1447_v25 = vpop.xlane.xlu1 %1446 }
 0x4b0   : > { %v1453_v21 = vsub.f32 %v1388_v1, %v1447_v25 }
 0x4b1   : > { %v1450_v20 = vpop.xlane.xlu0 %1449 }
 0x4b2   : > { %v1454_v22 = vsub.f32 %v1434_v5, %v1450_v20  ;;  %v1459_v23 = vmul.f32 1.442695, %v1453_v21 }
 0x4b4   : > { %v1461_v24 = vmul.f32 1.442695, %v1454_v22  ;;  %4298 = vpow2.f32 %v1459_v23 }
 0x4b6   : > { %v4739_v15 = vpop.eup %4294  ;;  %4300 = vpow2.f32 %v1461_v24 }
 0x4b7   : > { %v1463_v16 = vsel %vm1254_vm2, %v4739_v15, 0.0 }
 0x4b8   : > { %v4743_v17 = vpop.eup %4296  ;;  %1464 = vadd.xlane.f32.xlu1 %v1463_v16 }
 0x4b9   : > { %v1466_v19 = vsel %vm1254_vm2, %v4743_v17, 0.0 }
 0x4ba   : > { %1467 = vadd.xlane.f32.xlu0 %v1466_v19 }
 0x4be   : > { %v4753_v26 = vpop.eup %4298 }
 0x4c0   : > { %v4755_v30 = vpop.eup %4300 }
 0x4c9   : > { %1082 = vrot.lane.b32.xlu1 %v4624_v28, %s5307_s30  ;;  %v1469_v28 = vsel %vm1254_vm2, %v4753_v26, 0.0 }
 0x4cd   : > { %1084 = vrot.lane.b32.xlu1 %v4628_v29, %s5307_s30  ;;  %v1472_v29 = vsel %vm1254_vm2, %v4755_v30, 0.0 }
 0x4d0   : > { %1080 = vrot.lane.b32.xlu0 %v4620_v27, %s5307_s30  ;;  %v1079_v27 = vpop.permute.xlu1 %1078  ;;  %s5311_s30 = smov 16  }
 0x4d1   : > { %v1093_v34 = vrot.slane %v1079_v27, %v4632_v37 }
 0x4ef   : > { %1470 = vadd.xlane.f32.xlu0 %v1469_v28 }
 0x4f1   : > { %1473 = vadd.xlane.f32.xlu1 %v1472_v29 }
 0x545   : > { %v1465_v31 = vpop.xlane.xlu1 %1464 }
 0x546   : > { %4302 = vrcp.f32 %v1465_v31 }
 0x547   : > { %v1468_v32 = vpop.xlane.xlu0 %1467 }
 0x548   : > { %4304 = vrcp.f32 %v1468_v32 }
 0x549   : > { %v1083_v33 = vpop.permute.xlu1 %1082 }
 0x54a   : > { %v1101_v35 = vrot.slane %v1083_v33, %v4632_v37 }
 0x54b   : > { %v1081_v39 = vpop.permute.xlu0 %1080 }
 0x54c   : > { %v1102_v36 = vcombine.low %v1093_v34, %v1101_v35  ;;  %v1103_v38 = vcombine.high %v1093_v34, %v1101_v35  ;;  %v1127_v43 = vrot.slane %v1081_v39, %v4632_v37 }
 0x54d   : > { %v1085_v40 = vpop.permute.xlu1 %1084 }
 0x54e   : > { %v1110_v41 = vrot.slane %v1102_v36, %v4642_v46  ;;  %v1135_v42 = vrot.slane %v1085_v40, %v4632_v37  ;;  %v1117_v44 = vrot.slane %v1103_v38, %v4642_v46 }
 0x550   : > { %v1136_v47 = vcombine.low %v1127_v43, %v1135_v42  ;;  %v1137_v48 = vcombine.high %v1127_v43, %v1135_v42  ;;  %v1118_v49 = vcombine.high %v1110_v41, %v4411_v57  ;;  %v1119_v56 = vcombine.high %v1117_v44, %v4411_v57  ;;  %v4303_v16 = vpop.eup %4302 }
 0x551   : > { %v1158_v58 = vshrl.u32 %v1110_v41, 16  ;;  %v1174_v0 = vshrl.u32 %v1117_v44, 16  ;;  %v1479_v29 = vmul.f32 %v4303_v16, %v4739_v15 }
 0x552   : > { %v1144_v53 = vrot.slane %v1136_v47, %v4642_v46  ;;  %v1151_v55 = vrot.slane %v1137_v48, %v4642_v46  ;;  %v1166_v63 = vshrl.u32 %v1118_v49, 16  ;;  %v1182_v51 = vshrl.u32 %v1119_v56, 16  ;;  %v4305_v25 = vpop.eup %4304 }
 0x553   : > { %v1480_v34 = vmul.f32 %v4305_v25, %v4743_v17  ;;  %v1483_v42 = vpack.c.bf16 %v1479_v29, %v1479_v29 }
 0x554   : > { %v1152_v59 = vcombine.high %v1144_v53, %v4411_v57  ;;  %v1153_v60 = vcombine.high %v1151_v55, %v4411_v57  ;;  %v1156_v61 = vpack.i.b16 %v1144_v53, %v1110_v41  ;;  %v1159_v62 = vshrl.u32 %v1144_v53, 16 }
 0x555   : > { %v1172_v1 = vpack.i.b16 %v1151_v55, %v1117_v44  ;;  %v1175_v2 = vshrl.u32 %v1151_v55, 16  ;;  %v1484_v44 = vpack.c.bf16 %v1480_v34, %v1480_v34 }
 0x556   : > { %v1160_v3 = vpack.i.b16 %v1159_v62, %v1158_v58  ;;  %v1164_v4 = vpack.i.b16 %v1152_v59, %v1118_v49  ;;  %v1167_v5 = vshrl.u32 %v1152_v59, 16  ;;  %v1180_v50 = vpack.i.b16 %v1153_v60, %v1119_v56 }
 0x557   : > { %v1176_v52 = vpack.i.b16 %v1175_v2, %v1174_v0  ;;  %v1183_v54 = vshrl.u32 %v1153_v60, 16  ;;  %v1186_v6 = vcombine.low %v1156_v61, %v1172_v1 }
 0x558   : > { %v1168_v7 = vpack.i.b16 %v1167_v5, %v1166_v63  ;;  %v1194_v9 = vcombine.low %v1164_v4, %v1180_v50 }
 0x559   : > { %v1184_v10 = vpack.i.b16 %v1183_v54, %v1182_v51  ;;  %v1211_v11 = vcombine.low %v1160_v3, %v1176_v52  ;;  %v1193_v12 = vrot.slane %v1186_v6, %v4632_v37 }
 0x55a   : > { %v1201_v13 = vrot.slane %v1194_v9, %v4632_v37 }
 0x55b   : > { %v1219_v14 = vcombine.low %v1168_v7, %v1184_v10  ;;  %v1218_v20 = vrot.slane %v1211_v11, %v4632_v37 }
 0x55c   : > { %v1202_v19 = vcombine.low %v1193_v12, %v1201_v13 }
 0x55d   : > { %v1226_v21 = vrot.slane %v1219_v14, %v4632_v37 }
 0x55e   : > { %v1209_v22 = vrot.slane %v1202_v19, %v4642_v46 }
 0x55f   : > { %v1227_v23 = vcombine.low %v1218_v20, %v1226_v21  ;;  %v4262_v21 = vld [vmem:[%s5287_s6] sm:$0xff]  }
 0x560   : > { %v1210_v24 = vcombine.high %v1209_v22, %v4411_v57  ;;  %v1239_v31 = vshrl.u32 %v1209_v22, 16 }
 0x561   : > { %v1234_v28 = vrot.slane %v1227_v23, %v4642_v46 }
 0x562   : > { %v1245_v35 = vshrl.u32 %v1210_v24, 16 }
 0x563   : > { %v1238_v27 = vpack.i.b16 %v1234_v28, %v1209_v22  ;;  %v1240_v32 = vshrl.u32 %v1234_v28, 16  ;;  %v1235_v33 = vcombine.high %v1234_v28, %v4411_v57 }
 0x565   : > { %v1492_v36 = vsel %vm1490_vm3, %v1238_v27, 0  ;;  %v1241_v38 = vpack.i.b16 %v1240_v32, %v1239_v31  ;;  %v1244_v39 = vpack.i.b16 %v1235_v33, %v1210_v24  ;;  %v1246_v40 = vshrl.u32 %v1235_v33, 16  ;;  %v4263_v33 = vld [vmem:[%s5287_s6 + $0x8] sm:$0xff]  }
 0x566   : > { %4041 = vmatpush3.bf16.msra.mxu1 %v1492_v36 }
 0x567   : > { %v1538_v41 = vsel %vm1490_vm3, %v1241_v38, 0  ;;  %4052 = vmatprep.subr.bf16.mxu1 %v4403_v8  ;;  %v1247_v15 = vpack.i.b16 %v1246_v40, %v1245_v35  ;;  %v1584_v43 = vsel %vm1490_vm3, %v1244_v39, 0 }
 0x568   : > { %4047 = vmatpush3.bf16.msra.mxu0 %v1538_v41 }
 0x569   : > { %4043 = vmatmul.mubr.msk.bf16.vlgmr.msra.gmra.mrb[12].mxu1 %vm1254_vm2, %v1483_v42  ;;  %4058 = vmatprep.subr.bf16.mxu0 %v4403_v8  ;;  %v1630_v17 = vsel %vm1490_vm3, %v1247_v15, 0 }
 0x56a   : > { %4053 = vmatpush3.bf16.msra.mxu1 %v1584_v43  ;;  %4054 = vmatprep.mubr.msk.bf16.mxu1 %vm4404_vm1, %v4403_v8 }
 0x56b   : > { %4049 = vmatmul.mubr.msk.bf16.vlgmr.msra.gmra.mrb[8].mxu0 %vm1254_vm2, %v1484_v44  ;;  %4064 = vmatprep.subr.bf16.mxu1 %v4403_v8 }
 0x56c   : > { %4059 = vmatpush3.bf16.msra.mxu0 %v1630_v17  ;;  %4060 = vmatprep.mubr.msk.bf16.mxu0 %vm4404_vm1, %v4403_v8 }
 0x56d   : > { %4072 = vmatprep.subr.bf16.mxu0 %v4403_v8 }
 0x57c   : > { %v1471_v47 = vpop.xlane.xlu0 %1470 }
 0x57d   : > { %4306 = vrcp.f32 %v1471_v47 }
 0x57e   : > { %v1474_v48 = vpop.xlane.xlu1 %1473 }
 0x57f   : > { %4308 = vrcp.f32 %v1474_v48 }
 0x587   : > { %v4307_v49 = vpop.eup %4306 }
 0x588   : > { %v1481_v53 = vmul.f32 %v4307_v49, %v4753_v26 }
 0x589   : > { %v4309_v55 = vpop.eup %4308 }
 0x58a   : > { %v1482_v56 = vmul.f32 %v4309_v55, %v4755_v30  ;;  %v1485_v58 = vpack.c.bf16 %v1481_v53, %v1481_v53 }
 0x58c   : > { %4055 = vmatmul.mubr.msk.bf16.vlgmr.msra.gmra.mrb[16].mxu1 %vm1254_vm2, %v1485_v58  ;;  %v1486_v59 = vpack.c.bf16 %v1482_v56, %v1482_v56 }
 0x58d   : > { %4068 = vmatprep.mubr.msk.bf16.mxu1 %vm4404_vm1, %v4403_v8  ;;  %4065 = vmatpush3.bf16.msra.mxu1 %v4262_v21  ;;  %v4267_v21 = vld [vmem:[%s5293_s12 + $0x8] sm:$0xff]  }
 0x58e   : > { %4061 = vmatmul.mubr.msk.bf16.vlgmr.msra.gmra.mrb[12].mxu0 %vm1254_vm2, %v1486_v59  ;;  %4066 = vmatprep.subr.bf16.mxu1 %v4403_v8 }
 0x58f   : > { %4076 = vmatprep.mubr.msk.bf16.mxu0 %vm4404_vm1, %v4403_v8 }
 0x591   : > { %4067 = vmatpush3.bf16.msra.mxu1 %v4263_v33 }
 0x592   : > { %4080 = vmatprep.subr.bf16.mxu1 %v4403_v8 }
 0x63c   : > { %v1528_v60 = vpop.f32.mrb[12].mxu1 }
 0x63d   : > { %v4044_v61 = vpop.f32.mrb[13].mxu1 }
 0x63e   : > { %v1531_v62 = vpop.f32.mrb[14].mxu1  ;;  %v1574_v63 = vpop.f32.mrb[8].mxu0 }
 0x63f   : > { %v4045_v26 = vpop.f32.mrb[15].mxu1  ;;  %v4050_v0 = vpop.f32.mrb[9].mxu0 }
 0x640   : > { %v1577_v1 = vpop.f32.mrb[10].mxu0 }
 0x641   : > { %v4051_v30 = vpop.f32.mrb[11].mxu0 }
 0x65f   : > { %v1620_v2 = vpop.f32.mrb[16].mxu1 }
 0x660   : > { %v1672_v3 = vcombine.low %v1528_v60, %v1620_v2  ;;  %v1673_v4 = vcombine.high %v1528_v60, %v1620_v2  ;;  %v4056_v5 = vpop.f32.mrb[17].mxu1 }
 0x661   : > { %v1623_v50 = vpop.f32.mrb[18].mxu1  ;;  %v1666_v51 = vpop.f32.mrb[12].mxu0 }
 0x662   : > { %v1688_v52 = vcombine.low %v1574_v63, %v1666_v51  ;;  %v1689_v54 = vcombine.high %v1574_v63, %v1666_v51  ;;  %v4057_v6 = vpop.f32.mrb[19].mxu1  ;;  %v4062_v7 = vpop.f32.mrb[13].mxu0  ;;  %v1680_v10 = vrot.slane %v1672_v3, %v4632_v37  ;;  %v1687_v11 = vrot.slane %v1673_v4, %v4632_v37  ;;  %v3833_v63 = vld [vmem:[%s5288_s7] ss:$0 sm:$0xff] }
 0x663   : > { %v1669_v9 = vpop.f32.mrb[14].mxu0  ;;  %v4264_v6 = vld [vmem:[%s5291_s10] sm:$0xff]   ;;  %v4265_v7 = vld [vmem:[%s5291_s10 + $0x8] sm:$0xff]  }
 0x664   : > { %v1696_v12 = vrot.slane %v1688_v52, %v4632_v37  ;;  %v1703_v13 = vrot.slane %v1689_v54, %v4632_v37  ;;  %v4063_v14 = vpop.f32.mrb[15].mxu0  ;;  %4073 = vmatpush3.bf16.msra.mxu0 %v4264_v6 }
 0x665   : > { %4074 = vmatprep.subr.bf16.mxu0 %v4403_v8  ;;  %v3838_v14 = vld [vmem:[%s5290_s9] ss:$0 sm:$0xff] }
 0x666   : > { %v1704_v16 = vcombine.low %v1680_v10, %v1696_v12  ;;  %v1705_v19 = vcombine.high %v1680_v10, %v1696_v12  ;;  %v1720_v25 = vcombine.low %v1687_v11, %v1703_v13  ;;  %v1721_v20 = vcombine.high %v1687_v11, %v1703_v13  ;;  %v3837_v12 = vld [vmem:[%s5289_s8] ss:$0 sm:$0xff] }
 0x668   : > { %v1712_v22 = vrot.slane %v1704_v16, %v4642_v46  ;;  %v1719_v23 = vrot.slane %v1705_v19, %v4642_v46  ;;  %v1728_v24 = vrot.slane %v1720_v25, %v4642_v46  ;;  %v1735_v28 = vrot.slane %v1721_v20, %v4642_v46  ;;  %4075 = vmatpush3.bf16.msra.mxu0 %v4265_v7  ;;  %v4266_v20 = vld [vmem:[%s5293_s12] sm:$0xff]  }
 0x669   : > { %4100 = vmatprep.subr.bf16.mxu0 %v4403_v8 }
 0x66a   : > { %v1740_v29 = vcombine.low %v1712_v22, %v1719_v23  ;;  %v3831_v27 = vcombine.high %v1712_v22, %v1719_v23  ;;  %v1756_v31 = vcombine.low %v1728_v24, %v1735_v28  ;;  %v3832_v32 = vcombine.high %v1728_v24, %v1735_v28  ;;  %v4268_v22 = vld [vmem:[%s5293_s12 + $0x10] sm:$0xff]   ;;  %v4269_v23 = vld [vmem:[%s5293_s12 + $0x18] sm:$0xff]   ;;  %v4270_v24 = vld [vmem:[%s5293_s12 + $0x20] sm:$0xff]  }
 0x66b   : > { %v4271_v28 = vld [vmem:[%s5293_s12 + $0x28] sm:$0xff]  }
 0x66c   : > { %v1747_v34 = vrot.slane %v1740_v29, %v4632_v37  ;;  %v1755_v35 = vrot.slane %v3831_v27, %v4632_v37  ;;  %v1763_v36 = vrot.slane %v1756_v31, %v4632_v37  ;;  %v1771_v38 = vrot.slane %v3832_v32, %v4632_v37  ;;  %v4272_v29 = vld [vmem:[%s5293_s12 + $0x30] sm:$0xff]   ;;  %v4273_v27 = vld [vmem:[%s5293_s12 + $0x38] sm:$0xff]   ;;  %v3839_v31 = vld [vmem:[%s5292_s11] ss:$0 sm:$0xff] }
 0x66e   : > { %v1773_v39 = vcombine.high %v1747_v34, %v1755_v35  ;;  %v1789_v40 = vcombine.high %v1763_v36, %v1771_v38  ;;  %v1772_v41 = vcombine.low %v1747_v34, %v1755_v35  ;;  %v1788_v42 = vcombine.low %v1763_v36, %v1771_v38 }
 0x670   : > { %v1787_v15 = vrot.slane %v1773_v39, %v4642_v46  ;;  %v1803_v43 = vrot.slane %v1789_v40, %v4642_v46  ;;  %v1780_v44 = vrot.slane %v1772_v41, %v4642_v46  ;;  %v1796_v17 = vrot.slane %v1788_v42, %v4642_v46 }
 0x672   : > { %v1806_v47 = vcombine.low %v1787_v15, %v1803_v43  ;;  %v1805_v48 = vcombine.high %v1780_v44, %v1796_v17  ;;  %v1807_v49 = vcombine.high %v1787_v15, %v1803_v43  ;;  %v1804_v53 = vcombine.low %v1780_v44, %v1796_v17 }
 0x674   : > { %1813 = vrot.lane.b32.xlu1 %v1806_v47, %s5311_s30  ;;  %1809 = vrot.lane.b32.xlu0 %v1805_v48, %s5309_s26  ;;  %v3843_v48 = vld [vmem:[%s5294_s13] ss:$0 sm:$0xff]  ;;  %s5336_s30 = smov 104  }
 0x678   : > { %1817 = vrot.lane.b32.xlu0 %v1807_v49, %s5310_s27 }
 0x6e6   : > { %v1810_v55 = vpop.permute.xlu0 %1809  ;;  %v1814_v56 = vpop.permute.xlu1 %1813 }
 0x6e7   : > { %v1820_v58 = vsel %vm1254_vm2, %v1804_v53, %v1810_v55 }
 0x6e8   : > { %v1822_v60 = vsel %vm1821_vm4, %v1820_v58, %v1814_v56 }
 0x6ea   : > { %v1818_v59 = vpop.permute.xlu0 %1817 }
 0x6eb   : > { %v1824_v61 = vsel %vm1823_vm5, %v1822_v60, %v1818_v59 }
 0x6ec   : > { %v1829_v62 = vpack.c.bf16 %v1824_v61, %v1824_v61 }
 0x6ee   : > { %4069 = vmatmul.mubr.msk.bf16.vlgmr.msra.gmra.mrb[20].mxu1 %vm642_vm0, %v1829_v62 }
 0x6ef   : > { %4096 = vmatprep.mubr.msk.bf16.mxu1 %vm4404_vm1, %v4403_v8  ;;  %4081 = vmatpush3.bf16.msra.mxu1 %v4266_v20 }
 0x6f0   : > { %4082 = vmatprep.subr.bf16.mxu1 %v4403_v8 }
 0x6f3   : > { %4083 = vmatpush3.bf16.msra.mxu1 %v4267_v21 }
 0x6f4   : > { %4084 = vmatprep.subr.bf16.mxu1 %v4403_v8 }
 0x6f7   : > { %4085 = vmatpush3.bf16.msra.mxu1 %v4268_v22 }
 0x6f8   : > { %4086 = vmatprep.subr.bf16.mxu1 %v4403_v8 }
 0x6fb   : > { %4087 = vmatpush3.bf16.msra.mxu1 %v4269_v23 }
 0x6fc   : > { %4088 = vmatprep.subr.bf16.mxu1 %v4403_v8 }
 0x6ff   : > { %4089 = vmatpush3.bf16.msra.mxu1 %v4270_v24 }
 0x700   : > { %4090 = vmatprep.subr.bf16.mxu1 %v4403_v8 }
 0x703   : > { %4091 = vmatpush3.bf16.msra.mxu1 %v4271_v28 }
 0x704   : > { %4092 = vmatprep.subr.bf16.mxu1 %v4403_v8 }
 0x707   : > { %4093 = vmatpush3.bf16.msra.mxu1 %v4272_v29 }
 0x708   : > { %4094 = vmatprep.subr.bf16.mxu1 %v4403_v8 }
 0x70b   : > { %4095 = vmatpush3.bf16.msra.mxu1 %v4273_v27 }
 0x70c   : > { %4126 = vmatprep.subr.bf16.mxu1 %v4403_v8 }
 0x7c1   : > { %v1886_v26 = vpop.f32.mrb[20].mxu1 }
 0x7c2   : > { %v1887_v0 = vadd.f32 %v3833_v63, %v1886_v26  ;;  %v4070_v1 = vpop.f32.mrb[21].mxu1 }
 0x7c3   : > { %v1889_v30 = vpop.f32.mrb[22].mxu1  ;;  %v4274_v1 = vld [vmem:[%s5330_s3 + $0x10] sm:$0xff]  }
 0x7c4   : > { %v4071_v2 = vpop.f32.mrb[23].mxu1  ;;  %v1892_v3 = vadd.f32 %v1887_v0, %v4600_v18  ;;  %v4275_v30 = vld [vmem:[%s5330_s3 + $0x18] sm:$0xff]  }
 0x7c6   : > { %v1895_v4 = vsel %vm642_vm0, %v1892_v3, 0.0 }
 0x7c7   : > { %1896 = vadd.xlane.f32.xlu1 %v1895_v4 }
 0x854   : > { %v1897_v5 = vpop.xlane.xlu1 %1896 }
 0x855   : > { %v1898_v50 = vmul.f32 0.03125, %v1897_v5 }
 0x857   : > { %v1899_v51 = vsub.f32 %v1892_v3, %v1898_v50  ;;  %v3852_v50 = vld [vmem:[%s5295_s14] ss:$0 sm:$0xff] }
 0x859   : > { %v1900_v52 = vmul.f32 %v1899_v51, %v1899_v51 }
 0x85b   : > { %v1901_v54 = vsel %vm642_vm0, %v1900_v52, 0.0  ;;  %v3853_v52 = vld [vmem:[%s5296_s15] ss:$0 sm:$0xff] }
 0x85c   : > { %1902 = vadd.xlane.f32.xlu0 %v1901_v54 }
 0x8e9   : > { %v1903_v18 = vpop.xlane.xlu0 %1902 }
 0x8ea   : > { %v1904_v9 = vmul.f32 0.03125, %v1903_v18  ;;  %v3859_v18 = vld [vmem:[%s5286_s5 + $0x1] ss:$0 sm:$0xff] }
 0x8ec   : > { %v1905_v10 = vadd.f32 1e-12, %v1904_v9 }
 0x8ee   : > { %4310 = vrsqrt.f32 %v1905_v10 }
 0x8f8   : > { %v4311_v11 = vpop.eup %4310 }
 0x8f9   : > { %v1907_v13 = vmul.f32 %v4311_v11, %v1899_v51 }
 0x8fb   : > { %v1914_v16 = vmul.f32 %v3837_v12, %v1907_v13 }
 0x8fd   : > { %v1921_v19 = vadd.f32 %v3838_v14, %v1914_v16 }
 0x8ff   : > { %v1926_v25 = vpack.c.bf16 %v1921_v19, %v1921_v19 }
 0x901   : > { %4077 = vmatmul.mubr.msk.bf16.vlgmr.msra.gmra.mrb[16].mxu0 %vm642_vm0, %v1926_v25 }
 0x902   : > { %4104 = vmatprep.mubr.msk.bf16.mxu0 %vm4404_vm1, %v4403_v8  ;;  %4101 = vmatpush3.bf16.msra.mxu0 %v4274_v1 }
 0x903   : > { %4102 = vmatprep.subr.bf16.mxu0 %v4403_v8 }
 0x906   : > { %4103 = vmatpush3.bf16.msra.mxu0 %v4275_v30 }
 0x907   : > { %4108 = vmatprep.subr.bf16.mxu0 %v4403_v8 }
 0x9d4   : > { %v1983_v32 = vpop.f32.mrb[16].mxu0 }
 0x9d5   : > { %v1984_v33 = vadd.f32 %v3839_v31, %v1983_v32  ;;  %v4078_v34 = vpop.f32.mrb[17].mxu0 }
 0x9d6   : > { %v1986_v35 = vpop.f32.mrb[18].mxu0 }
 0x9d7   : > { %v1989_v36 = vmul.f32 %v1984_v33, %v1984_v33  ;;  %v4079_v38 = vpop.f32.mrb[19].mxu0 }
 0x9d9   : > { %v1990_v39 = vmul.f32 %v1989_v36, %v1984_v33 }
 0x9db   : > { %v1991_v40 = vmul.f32 0.044715, %v1990_v39 }
 0x9dd   : > { %v1992_v41 = vadd.f32 %v1991_v40, %v1984_v33 }
 0x9df   : > { %v1993_v42 = vmul.f32 0.7978846, %v1992_v41 }
 0x9e1   : > { %4312 = vtanh.f32 %v1993_v42 }
 0x9eb   : > { %v4313_v15 = vpop.eup %4312 }
 0x9ec   : > { %v1995_v43 = vadd.f32 1.0, %v4313_v15 }
 0x9ee   : > { %v1996_v44 = vmul.f32 0.5, %v1995_v43 }
 0x9f0   : > { %v1997_v17 = vmul.f32 %v1996_v44, %v1984_v33 }
 0x9f2   : > { %v2014_v47 = vpack.c.bf16 %v1997_v17, %v1997_v17 }
 0x9f4   : > { %4097 = vmatmul.mubr.bf16.vlgmr.msra.gmra.mrb[24].mxu1 %v2014_v47 }
 0x9f5   : > { %4128 = vmatprep.mubr.msk.bf16.mxu1 %vm4404_vm1, %v4403_v8 }
 0xac7   : > { %v2104_v49 = vpop.f32.mrb[24].mxu1 }
 0xac8   : > { %v2105_v53 = vadd.f32 %v3843_v48, %v2104_v49  ;;  %v4098_v55 = vpop.f32.mrb[25].mxu1 }
 0xac9   : > { %v2107_v56 = vpop.f32.mrb[26].mxu1 }
 0xaca   : > { %v4099_v58 = vpop.f32.mrb[27].mxu1  ;;  %v2110_v59 = vadd.f32 %v2105_v53, %v1921_v19 }
 0xacc   : > { %v2113_v60 = vsel %vm642_vm0, %v2110_v59, 0.0 }
 0xacd   : > { %2114 = vadd.xlane.f32.xlu0 %v2113_v60 }
 0xb5a   : > { %v2115_v61 = vpop.xlane.xlu0 %2114 }
 0xb5b   : > { %v2116_v62 = vmul.f32 0.03125, %v2115_v61 }
 0xb5d   : > { %v2117_v63 = vsub.f32 %v2110_v59, %v2116_v62 }
 0xb5f   : > { %v2118_v26 = vmul.f32 %v2117_v63, %v2117_v63 }
 0xb61   : > { %v2119_v0 = vsel %vm642_vm0, %v2118_v26, 0.0 }
 0xb62   : > { %2120 = vadd.xlane.f32.xlu1 %v2119_v0 }
 0xbef   : > { %v2121_v2 = vpop.xlane.xlu1 %2120 }
 0xbf0   : > { %v2122_v3 = vmul.f32 0.03125, %v2121_v2 }
 0xbf2   : > { %v2123_v4 = vadd.f32 1e-12, %v2122_v3 }
 0xbf4   : > { %4314 = vrsqrt.f32 %v2123_v4 }
 0xbfe   : > { %v4315_v5 = vpop.eup %4314 }
 0xbff   : > { %v2125_v51 = vmul.f32 %v4315_v5, %v2117_v63 }
 0xc01   : > { %v2132_v54 = vmul.f32 %v3852_v50, %v2125_v51 }
 0xc03   : > { %v4917_v6 = vadd.f32 %v3853_v52, %v2132_v54 }
 0xc05   : > { %v2145_v7 = vpack.c.bf16 %v4917_v6, %v4917_v6 }
 0xc07   : > { %4105 = vmatmul.mubr.msk.bf16.vlgmr.msra.gmra.mrb[20].mxu0 %vm642_vm0, %v2145_v7 }
 0xc08   : > { %4110 = vmatprep.mubr.msk.bf16.mxu0 %vm4404_vm1, %v4403_v8 }
 0xcda   : > { %v2203_v9 = vpop.f32.mrb[20].mxu0 }
 0xcdb   : > { %v2204_v10 = vadd.f32 %v3859_v18, %v2203_v9  ;;  %v4106_v11 = vpop.f32.mrb[21].mxu0 }
 0xcdc   : > { %v2206_v12 = vpop.f32.mrb[22].mxu0 }
 0xcdd   : > { %v4927_v13 = vpack.c.bf16 %v2204_v10, %v2204_v10  ;;  %v4107_v14 = vpop.f32.mrb[23].mxu0 }
 0xcdf   : > { %2213 = vrot.lane.b32.xlu1 %v4927_v13, %s5334_s28  ;;  %2211 = vrot.lane.b32.xlu0 %v4927_v13, %s5335_s25  ;;  %v2223_v23 = vrot.slane %v4927_v13, %v4632_v37  ;;  %s5339_s28 = smov 16   ;;  %s5340_s25 = smov 8  }
 0xce3   : > { %2215 = vrot.lane.b32.xlu1 %v4927_v13, %s5336_s30  ;;  %2378 = vrot.lane.b32.xlu0 %v4927_v13, %s5337_s0  ;;  %s5341_s30 = smov 24  }
 0xd51   : > { %v4937_v16 = vpop.permute.xlu1 %2213  ;;  %v4939_v19 = vpop.permute.xlu0 %2211 }
 0xd52   : > { %2382 = vrot.lane.b32.xlu0 %v4937_v16, %s5337_s0  ;;  %2380 = vrot.lane.b32.xlu1 %v4939_v19, %s5337_s0  ;;  %v2231_v21 = vrot.slane %v4937_v16, %v4632_v37  ;;  %v2257_v22 = vrot.slane %v4939_v19, %v4632_v37 }
 0xd54   : > { %v2232_v29 = vcombine.low %v2223_v23, %v2231_v21  ;;  %v2233_v27 = vcombine.high %v2223_v23, %v2231_v21 }
 0xd55   : > { %v4945_v25 = vpop.permute.xlu1 %2215  ;;  %v2379_v34 = vpop.permute.xlu0 %2378 }
 0xd56   : > { %2384 = vrot.lane.b32.xlu1 %v4945_v25, %s5337_s0  ;;  %v2265_v20 = vrot.slane %v4945_v25, %v4632_v37  ;;  %v4964_v33 = vrot.slane %v2232_v29, %v4642_v46  ;;  %v4967_v35 = vrot.slane %v2233_v27, %v4642_v46  ;;  %v2393_v15 = vrot.slane %v2379_v34, %v4632_v37 }
 0xd58   : > { %v2266_v24 = vcombine.low %v2257_v22, %v2265_v20  ;;  %v2267_v28 = vcombine.high %v2257_v22, %v2265_v20  ;;  %v2248_v39 = vcombine.high %v4964_v33, %v4411_v57  ;;  %v2249_v42 = vcombine.high %v4967_v35, %v4411_v57 }
 0xd59   : > { %v2288_v60 = vshrl.u32 %v4964_v33, 16  ;;  %v2304_v1 = vshrl.u32 %v4967_v35, 16 }
 0xd5a   : > { %v4958_v31 = vrot.slane %v2266_v24, %v4642_v46  ;;  %v4961_v32 = vrot.slane %v2267_v28, %v4642_v46  ;;  %v2296_v49 = vshrl.u32 %v2248_v39, 16  ;;  %v2312_v55 = vshrl.u32 %v2249_v42, 16 }
 0xd5c   : > { %v2282_v36 = vcombine.high %v4958_v31, %v4411_v57  ;;  %v2283_v38 = vcombine.high %v4961_v32, %v4411_v57  ;;  %v2289_v56 = vshrl.u32 %v4958_v31, 16  ;;  %v2305_v63 = vshrl.u32 %v4961_v32, 16 }
 0xd5d   : > { %v2286_v3 = vpack.i.b16 %v4958_v31, %v4964_v33  ;;  %v2302_v5 = vpack.i.b16 %v4961_v32, %v4967_v35 }
 0xd5e   : > { %v2297_v44 = vshrl.u32 %v2282_v36, 16  ;;  %v2313_v17 = vshrl.u32 %v2283_v38, 16  ;;  %v2290_v4 = vpack.i.b16 %v2289_v56, %v2288_v60  ;;  %v2294_v51 = vpack.i.b16 %v2282_v36, %v2248_v39 }
 0xd5f   : > { %v2310_v52 = vpack.i.b16 %v2283_v38, %v2249_v42  ;;  %v2306_v18 = vpack.i.b16 %v2305_v63, %v2304_v1 }
 0xd60   : > { %v2298_v62 = vpack.i.b16 %v2297_v44, %v2296_v49  ;;  %v2314_v26 = vpack.i.b16 %v2313_v17, %v2312_v55 }
 0xd61   : > { %v2324_v38 = vcombine.low %v2294_v51, %v2310_v52 }
 0xd62   : > { %v2349_v9 = vcombine.low %v2298_v62, %v2314_v26 }
 0xd63   : > { %v2331_v49 = vrot.slane %v2324_v38, %v4632_v37 }
 0xdc4   : > { %v2381_v40 = vpop.permute.xlu1 %2380  ;;  %v2383_v41 = vpop.permute.xlu0 %2382 }
 0xdc5   : > { %v2401_v43 = vrot.slane %v2383_v41, %v4632_v37  ;;  %v2427_v61 = vrot.slane %v2381_v40, %v4632_v37  ;;  %v2341_v41 = vcombine.low %v2290_v4, %v2306_v18 }
 0xdc7   : > { %v2402_v47 = vcombine.low %v2393_v15, %v2401_v43  ;;  %v2403_v48 = vcombine.high %v2393_v15, %v2401_v43  ;;  %v2316_v43 = vcombine.low %v2286_v3, %v2302_v5  ;;  %v2348_v55 = vrot.slane %v2341_v41, %v4632_v37 }
 0xdc8   : > { %v2385_v53 = vpop.permute.xlu1 %2384 }
 0xdc9   : > { %v2410_v58 = vrot.slane %v2402_v47, %v4642_v46  ;;  %v2435_v59 = vrot.slane %v2385_v53, %v4632_v37  ;;  %v2417_v0 = vrot.slane %v2403_v48, %v4642_v46  ;;  %v2356_v47 = vrot.slane %v2349_v9, %v4632_v37 }
 0xdcb   : > { %v2436_v30 = vcombine.low %v2427_v61, %v2435_v59  ;;  %v2437_v2 = vcombine.high %v2427_v61, %v2435_v59  ;;  %v2418_v50 = vcombine.high %v2410_v58, %v4411_v57  ;;  %v2419_v10 = vcombine.high %v2417_v0, %v4411_v57 }
 0xdcc   : > { %v2458_v11 = vshrl.u32 %v2410_v58, 16  ;;  %v2474_v23 = vshrl.u32 %v2417_v0, 16  ;;  %v2323_v59 = vrot.slane %v2316_v43, %v4632_v37  ;;  %v2357_v62 = vcombine.low %v2348_v55, %v2356_v47 }
 0xdcd   : > { %v2444_v54 = vrot.slane %v2436_v30, %v4642_v46  ;;  %v2451_v7 = vrot.slane %v2437_v2, %v4642_v46  ;;  %v2466_v22 = vshrl.u32 %v2418_v50, 16  ;;  %v2482_v33 = vshrl.u32 %v2419_v10, 16 }
 0xdce   : > { %v2332_v63 = vcombine.low %v2323_v59, %v2331_v49  ;;  %v2364_v2 = vrot.slane %v2357_v62, %v4642_v46  ;;  %v4338_v49 = vld [vmem:[%s4724_s21] ss:$0 sm:$0xff]  ;;  %s3931_s21 = sshll.u32 %s4543_s2, 4 }
 0xdcf   : > { %v2452_v12 = vcombine.high %v2444_v54, %v4411_v57  ;;  %v2453_v14 = vcombine.high %v2451_v7, %v4411_v57  ;;  %v2456_v20 = vpack.i.b16 %v2444_v54, %v2410_v58  ;;  %v2459_v21 = vshrl.u32 %v2444_v54, 16 }
 0xdd0   : > { %v2472_v24 = vpack.i.b16 %v2451_v7, %v2417_v0  ;;  %v2475_v28 = vshrl.u32 %v2451_v7, 16  ;;  %v2339_v3 = vrot.slane %v2332_v63, %v4642_v46  ;;  %v2365_v7 = vcombine.high %v2364_v2, %v4411_v57 }
 0xdd1   : > { %v2460_v29 = vpack.i.b16 %v2459_v21, %v2458_v11  ;;  %v2464_v27 = vpack.i.b16 %v2452_v12, %v2418_v50  ;;  %v2467_v31 = vshrl.u32 %v2452_v12, 16  ;;  %v2480_v32 = vpack.i.b16 %v2453_v14, %v2419_v10 }
 0xdd2   : > { %v2476_v34 = vpack.i.b16 %v2475_v28, %v2474_v23  ;;  %v2483_v35 = vshrl.u32 %v2453_v14, 16  ;;  %v2486_v36 = vcombine.low %v2456_v20, %v2472_v24  ;;  %v2340_v10 = vcombine.high %v2339_v3, %v4411_v57 }
 0xdd3   : > { %v2468_v39 = vpack.i.b16 %v2467_v31, %v2466_v22  ;;  %v2494_v40 = vcombine.low %v2464_v27, %v2480_v32  ;;  %v2368_v11 = vpack.i.b16 %v2364_v2, %v2339_v3  ;;  %v2376_v12 = vshrl.u32 %v2365_v7, 16 }
 0xdd4   : > { %v2484_v42 = vpack.i.b16 %v2483_v35, %v2482_v33  ;;  %v2511_v15 = vcombine.low %v2460_v29, %v2476_v34  ;;  %v2493_v44 = vrot.slane %v2486_v36, %v4632_v37  ;;  %v2375_v20 = vshrl.u32 %v2340_v10, 16 }
 0xdd5   : > { %v2501_v17 = vrot.slane %v2494_v40, %v4632_v37  ;;  %v2370_v22 = vshrl.u32 %v2364_v2, 16  ;;  %v2369_v23 = vshrl.u32 %v2339_v3, 16  ;;  %v2374_v27 = vpack.i.b16 %v2365_v7, %v2340_v10 }
 0xdd6   : > { %v2519_v48 = vcombine.low %v2468_v39, %v2484_v42  ;;  %v2518_v56 = vrot.slane %v2511_v15, %v4632_v37  ;;  %v2377_v21 = vpack.i.b16 %v2376_v12, %v2375_v20 }
 0xdd7   : > { %v2502_v53 = vcombine.low %v2493_v44, %v2501_v17  ;;  %v2371_v28 = vpack.i.b16 %v2370_v22, %v2369_v23 }
 0xdd8   : > { %v2526_v58 = vrot.slane %v2519_v48, %v4632_v37 }
 0xdd9   : > { %v2509_v60 = vrot.slane %v2502_v53, %v4642_v46 }
 0xdda   : > { %v2527_v61 = vcombine.low %v2518_v56, %v2526_v58 }
 0xddb   : > { %v2510_v0 = vcombine.high %v2509_v60, %v4411_v57  ;;  %v2539_v54 = vshrl.u32 %v2509_v60, 16 }
 0xddc   : > { %v2534_v26 = vrot.slane %v2527_v61, %v4642_v46 }
 0xddd   : > { %v2545_v5 = vshrl.u32 %v2510_v0, 16 }
 0xdde   : > { %v2538_v1 = vpack.i.b16 %v2534_v26, %v2509_v60  ;;  %v2535_v30 = vcombine.high %v2534_v26, %v4411_v57  ;;  %v2540_v51 = vshrl.u32 %v2534_v26, 16 }
 0xde0   : > { %v2722_v4 = vsel %vm1254_vm2, %v2538_v1, 0  ;;  %v2546_v50 = vshrl.u32 %v2535_v30, 16  ;;  %v2541_v9 = vpack.i.b16 %v2540_v51, %v2539_v54  ;;  %v2544_v24 = vpack.i.b16 %v2535_v30, %v2510_v0 }
 0xde1   : > { %4109 = vmatpush3.bf16.xpose.msra.mxu0 %v2722_v4 }
 0xde2   : > { %v2547_v52 = vpack.i.b16 %v2546_v50, %v2545_v5  ;;  %4114 = vmatprep.subr.bf16.mxu0 %v4403_v8  ;;  %v2768_v14 = vsel %vm1254_vm2, %v2541_v9, 0  ;;  %v2814_v29 = vsel %vm1254_vm2, %v2544_v24, 0 }
 0xde4   : > { %v2860_v18 = vsel %vm1254_vm2, %v2547_v52, 0 }
 0xde5   : > { %4127 = vmatpush3.bf16.xpose.msra.mxu1 %v2860_v18 }
 0xde6   : > { %4138 = vmatprep.subr.bf16.mxu1 %v4403_v8 }
 0xde8   : > { %4111 = vmatmul.mubr.msk.bf16.vlgmr.msra.gmra.mrb[24].mxu0 %vm1254_vm2, %v2368_v11 }
 0xde9   : > { %4115 = vmatpush3.bf16.xpose.msra.mxu0 %v2768_v14  ;;  %4116 = vmatprep.mubr.msk.bf16.mxu0 %vm4404_vm1, %v4403_v8 }
 0xdea   : > { %4120 = vmatprep.subr.bf16.mxu0 %v4403_v8 }
 0xdec   : > { %4129 = vmatmul.mubr.msk.bf16.vlgmr.msra.gmra.mrb[28].mxu1 %vm1254_vm2, %v2377_v21 }
 0xded   : > { %4140 = vmatprep.mubr.msk.bf16.mxu1 %vm4404_vm1, %v4403_v8 }
 0xdf0   : > { %4117 = vmatmul.mubr.msk.bf16.vlgmr.msra.gmra.mrb[28].mxu0 %vm1254_vm2, %v2371_v28 }
 0xdf1   : > { %4121 = vmatpush3.bf16.xpose.msra.mxu0 %v2814_v29  ;;  %4122 = vmatprep.mubr.msk.bf16.mxu0 %vm4404_vm1, %v4403_v8 }
 0xdf2   : > { %4132 = vmatprep.subr.bf16.mxu0 %v4403_v8 }
 0xdf8   : > { %4123 = vmatmul.mubr.msk.bf16.vlgmr.msra.gmra.mrb[32].mxu0 %vm1254_vm2, %v2374_v27 }
 0xdf9   : > { %4134 = vmatprep.mubr.msk.bf16.mxu0 %vm4404_vm1, %v4403_v8 }
 0xebb   : > { %v2758_v31 = vpop.f32.mrb[24].mxu0 }
 0xebc   : > { %v2759_v32 = vadd.f32 %v4727_v45, %v2758_v31  ;;  %v4112_v33 = vpop.f32.mrb[25].mxu0 }
 0xebd   : > { %v2761_v34 = vpop.f32.mrb[26].mxu0 }
 0xebe   : > { %v4113_v35 = vpop.f32.mrb[27].mxu0  ;;  %v2902_v36 = vsel %vm1254_vm2, %v2759_v32, -inf }
 0xebf   : > { %2903 = vmax.xlane.f32.xlu0 %v2902_v36  ;;  %v2896_v38 = vpop.f32.mrb[28].mxu1 }
 0xec0   : > { %v4130_v39 = vpop.f32.mrb[29].mxu1  ;;  %v2897_v58 = vadd.f32 %v4338_v49, %v2896_v38 }
 0xec1   : > { %v2899_v40 = vpop.f32.mrb[30].mxu1 }
 0xec2   : > { %v4131_v41 = vpop.f32.mrb[31].mxu1  ;;  %v2911_v61 = vsel %vm1254_vm2, %v2897_v58, -inf }
 0xec3   : > { %v2804_v42 = vpop.f32.mrb[28].mxu0 }
 0xec4   : > { %v2805_v15 = vadd.f32 %v4727_v45, %v2804_v42  ;;  %v4118_v43 = vpop.f32.mrb[29].mxu0 }
 0xec5   : > { %v2807_v44 = vpop.f32.mrb[30].mxu0 }
 0xec6   : > { %v4119_v17 = vpop.f32.mrb[31].mxu0  ;;  %v2905_v47 = vsel %vm1254_vm2, %v2805_v15, -inf }
 0xec7   : > { %2906 = vmax.xlane.f32.xlu1 %v2905_v47 }
 0xecb   : > { %v2850_v48 = vpop.f32.mrb[32].mxu0 }
 0xecc   : > { %v2851_v53 = vadd.f32 %v4338_v49, %v2850_v48  ;;  %v4124_v55 = vpop.f32.mrb[33].mxu0 }
 0xecd   : > { %v2853_v56 = vpop.f32.mrb[34].mxu0 }
 0xece   : > { %v4125_v59 = vpop.f32.mrb[35].mxu0  ;;  %v2908_v60 = vsel %vm1254_vm2, %v2851_v53, -inf }
 0xecf   : > { %2909 = vmax.xlane.f32.xlu0 %v2908_v60 }
 0xed3   : > { %2912 = vmax.xlane.f32.xlu0 %v2911_v61 }
 0xed8   : > { %2548 = vrot.lane.b32.xlu1 %v4927_v13, %s5338_s23 }
 0xf4c   : > { %v2904_v45 = vpop.xlane.xlu0 %2903 }
 0xf4d   : > { %v2914_v62 = vsub.f32 %v2759_v32, %v2904_v45 }
 0xf4f   : > { %v2918_v63 = vmul.f32 1.442695, %v2914_v62 }
 0xf51   : > { %4316 = vpow2.f32 %v2918_v63 }
 0xf54   : > { %v2907_v26 = vpop.xlane.xlu1 %2906 }
 0xf55   : > { %v2915_v0 = vsub.f32 %v2805_v15, %v2907_v26 }
 0xf57   : > { %v2920_v1 = vmul.f32 1.442695, %v2915_v0 }
 0xf59   : > { %4318 = vpow2.f32 %v2920_v1 }
 0xf5b   : > { %v5042_v30 = vpop.eup %4316 }
 0xf5c   : > { %v2926_v2 = vsel %vm1254_vm2, %v5042_v30, 0.0  ;;  %v2910_v13 = vpop.xlane.xlu0 %2909 }
 0xf5d   : > { %2927 = vadd.xlane.f32.xlu1 %v2926_v2  ;;  %v2916_v51 = vsub.f32 %v2851_v53, %v2910_v13 }
 0xf5f   : > { %v2922_v54 = vmul.f32 1.442695, %v2916_v51 }
 0xf60   : > { %v2913_v5 = vpop.xlane.xlu0 %2912 }
 0xf61   : > { %v2917_v50 = vsub.f32 %v2897_v58, %v2913_v5 }
 0xf63   : > { %v5046_v3 = vpop.eup %4318  ;;  %v2924_v52 = vmul.f32 1.442695, %v2917_v50 }
 0xf64   : > { %v2929_v4 = vsel %vm1254_vm2, %v5046_v3, 0.0 }
 0xf65   : > { %2930 = vadd.xlane.f32.xlu0 %v2929_v4  ;;  %4320 = vpow2.f32 %v2924_v52 }
 0xf66   : > { %4322 = vpow2.f32 %v2922_v54 }
 0xf6e   : > { %2552 = vrot.lane.b32.xlu1 %v4937_v16, %s5338_s23 }
 0xf6f   : > { %v5056_v7 = vpop.eup %4320 }
 0xf70   : > { %v2935_v18 = vsel %vm1254_vm2, %v5056_v7, 0.0  ;;  %v5060_v16 = vpop.eup %4322 }
 0xf72   : > { %2554 = vrot.lane.b32.xlu1 %v4945_v25, %s5338_s23  ;;  %v2932_v25 = vsel %vm1254_vm2, %v5060_v16, 0.0 }
 0xf7b   : > { %2550 = vrot.lane.b32.xlu0 %v4939_v19, %s5338_s23  ;;  %v2549_v19 = vpop.permute.xlu1 %2548  ;;  %s4416_s23 = smov [#allocation2]  }
 0xf7c   : > { %v2563_v12 = vrot.slane %v2549_v19, %v4632_v37  ;;  %s4343_s3 = sshll.u32 %s4416_s23, 4  ;;  %s4344_s3 = int_to_ptr.vmem [resolvable:$false] %s4343_s3 }
 0xf7d   : > { %s4345_s26 = scalar_lea.vmem %s4344_s3, 32 }
 0xf96   : > { %2936 = vadd.xlane.f32.xlu1 %v2935_v18 }
 0xf9a   : > { %2933 = vadd.xlane.f32.xlu0 %v2932_v25 }
 0xfea   : > { %v2928_v9 = vpop.xlane.xlu1 %2927 }
 0xfeb   : > { %4324 = vrcp.f32 %v2928_v9 }
 0xfee   : > { %v2553_v10 = vpop.permute.xlu1 %2552 }
 0xfef   : > { %v2571_v11 = vrot.slane %v2553_v10, %v4632_v37 }
 0xff1   : > { %v2572_v14 = vcombine.low %v2563_v12, %v2571_v11  ;;  %v2573_v21 = vcombine.high %v2563_v12, %v2571_v11 }
 0xff2   : > { %v2931_v20 = vpop.xlane.xlu0 %2930  ;;  %v2555_v22 = vpop.permute.xlu1 %2554 }
 0xff3   : > { %v2580_v23 = vrot.slane %v2572_v14, %v4642_v46  ;;  %v2605_v28 = vrot.slane %v2555_v22, %v4632_v37  ;;  %v2587_v27 = vrot.slane %v2573_v21, %v4642_v46  ;;  %4326 = vrcp.f32 %v2931_v20 }
 0xff5   : > { %v2588_v33 = vcombine.high %v2580_v23, %v4411_v57  ;;  %v2589_v36 = vcombine.high %v2587_v27, %v4411_v57  ;;  %v2628_v38 = vshrl.u32 %v2580_v23, 16  ;;  %v2644_v43 = vshrl.u32 %v2587_v27, 16  ;;  %v4325_v1 = vpop.eup %4324 }
 0xff6   : > { %v2551_v24 = vpop.permute.xlu0 %2550  ;;  %v2942_v18 = vmul.f32 %v4325_v1, %v5042_v30 }
 0xff7   : > { %v2597_v29 = vrot.slane %v2551_v24, %v4632_v37  ;;  %v2636_v15 = vshrl.u32 %v2588_v33, 16  ;;  %v2652_v55 = vshrl.u32 %v2589_v36, 16 }
 0xff8   : > { %v2946_v24 = vpack.c.bf16 %v2942_v18, %v2942_v18 }
 0xff9   : > { %v2606_v31 = vcombine.low %v2597_v29, %v2605_v28  ;;  %v2607_v32 = vcombine.high %v2597_v29, %v2605_v28 }
 0xffb   : > { %v2614_v34 = vrot.slane %v2606_v31, %v4642_v46  ;;  %v2621_v35 = vrot.slane %v2607_v32, %v4642_v46 }
 0xffd   : > { %v2622_v39 = vcombine.high %v2614_v34, %v4411_v57  ;;  %v2623_v40 = vcombine.high %v2621_v35, %v4411_v57  ;;  %v2626_v41 = vpack.i.b16 %v2614_v34, %v2580_v23  ;;  %v2629_v42 = vshrl.u32 %v2614_v34, 16  ;;  %v4327_v4 = vpop.eup %4326 }
 0xffe   : > { %v2642_v44 = vpack.i.b16 %v2621_v35, %v2587_v27  ;;  %v2645_v17 = vshrl.u32 %v2621_v35, 16  ;;  %v2943_v11 = vmul.f32 %v4327_v4, %v5046_v3  ;;  %v4276_v4 = vld [vmem:[%s5287_s6 + $0x10] sm:$0xff]  }
 0xfff   : > { %v2630_v47 = vpack.i.b16 %v2629_v42, %v2628_v38  ;;  %v2634_v48 = vpack.i.b16 %v2622_v39, %v2588_v33  ;;  %v2637_v49 = vshrl.u32 %v2622_v39, 16  ;;  %v2650_v53 = vpack.i.b16 %v2623_v40, %v2589_v36 }
0x1000   : > { %v2646_v56 = vpack.i.b16 %v2645_v17, %v2644_v43  ;;  %v2653_v58 = vshrl.u32 %v2623_v40, 16  ;;  %v2656_v59 = vcombine.low %v2626_v41, %v2642_v44  ;;  %v2947_v28 = vpack.c.bf16 %v2943_v11, %v2943_v11 }
0x1001   : > { %v2638_v60 = vpack.i.b16 %v2637_v49, %v2636_v15  ;;  %v2664_v61 = vcombine.low %v2634_v48, %v2650_v53 }
0x1002   : > { %v2654_v45 = vpack.i.b16 %v2653_v58, %v2652_v55  ;;  %v2681_v62 = vcombine.low %v2630_v47, %v2646_v56  ;;  %v2663_v63 = vrot.slane %v2656_v59, %v4632_v37 }
0x1003   : > { %v2671_v26 = vrot.slane %v2664_v61, %v4632_v37 }
0x1004   : > { %v2689_v0 = vcombine.low %v2638_v60, %v2654_v45  ;;  %v2688_v13 = vrot.slane %v2681_v62, %v4632_v37 }
0x1005   : > { %v2672_v2 = vcombine.low %v2663_v63, %v2671_v26 }
0x1006   : > { %v2696_v5 = vrot.slane %v2689_v0, %v4632_v37 }
0x1007   : > { %v2679_v50 = vrot.slane %v2672_v2, %v4642_v46 }
0x1008   : > { %v2697_v51 = vcombine.low %v2688_v13, %v2696_v5 }
0x1009   : > { %v2680_v52 = vcombine.high %v2679_v50, %v4411_v57  ;;  %v2709_v19 = vshrl.u32 %v2679_v50, 16 }
0x100a   : > { %v2704_v54 = vrot.slane %v2697_v51, %v4642_v46 }
0x100b   : > { %v2715_v12 = vshrl.u32 %v2680_v52, 16 }
0x100c   : > { %v2708_v25 = vpack.i.b16 %v2704_v54, %v2679_v50  ;;  %v2710_v9 = vshrl.u32 %v2704_v54, 16  ;;  %v2705_v10 = vcombine.high %v2704_v54, %v4411_v57 }
0x100e   : > { %v2954_v14 = vsel %vm1490_vm3, %v2708_v25, 0  ;;  %v2711_v20 = vpack.i.b16 %v2710_v9, %v2709_v19  ;;  %v2714_v21 = vpack.i.b16 %v2705_v10, %v2680_v52  ;;  %v2716_v22 = vshrl.u32 %v2705_v10, 16  ;;  %v4277_v19 = vld [vmem:[%s5287_s6 + $0x18] sm:$0xff]  }
0x100f   : > { %4133 = vmatpush3.bf16.msra.mxu0 %v2954_v14 }
0x1010   : > { %v3000_v23 = vsel %vm1490_vm3, %v2711_v20, 0  ;;  %4144 = vmatprep.subr.bf16.mxu0 %v4403_v8  ;;  %v2717_v30 = vpack.i.b16 %v2716_v22, %v2715_v12  ;;  %v3046_v57 = vsel %vm1490_vm3, %v2714_v21, 0 }
0x1011   : > { %4139 = vmatpush3.bf16.msra.mxu1 %v3000_v23 }
0x1012   : > { %4135 = vmatmul.mubr.msk.bf16.vlgmr.msra.gmra.mrb[36].mxu0 %vm1254_vm2, %v2946_v24  ;;  %4150 = vmatprep.subr.bf16.mxu1 %v4403_v8  ;;  %v3092_v3 = vsel %vm1490_vm3, %v2717_v30, 0 }
0x1013   : > { %4145 = vmatpush3.bf16.msra.mxu0 %v3046_v57  ;;  %4146 = vmatprep.mubr.msk.bf16.mxu0 %vm4404_vm1, %v4403_v8 }
0x1014   : > { %4141 = vmatmul.mubr.msk.bf16.vlgmr.msra.gmra.mrb[32].mxu1 %vm1254_vm2, %v2947_v28  ;;  %4156 = vmatprep.subr.bf16.mxu0 %v4403_v8 }
0x1015   : > { %4151 = vmatpush3.bf16.msra.mxu1 %v3092_v3  ;;  %4152 = vmatprep.mubr.msk.bf16.mxu1 %vm4404_vm1, %v4403_v8 }
0x1016   : > { %4164 = vmatprep.subr.bf16.mxu1 %v4403_v8 }
0x1023   : > { %v2937_v29 = vpop.xlane.xlu1 %2936 }
0x1024   : > { %4328 = vrcp.f32 %v2937_v29 }
0x1027   : > { %v2934_v27 = vpop.xlane.xlu0 %2933 }
0x1028   : > { %4330 = vrcp.f32 %v2934_v27 }
0x102e   : > { %v4329_v31 = vpop.eup %4328 }
0x102f   : > { %v2945_v32 = vmul.f32 %v4329_v31, %v5056_v7 }
0x1031   : > { %v2949_v33 = vpack.c.bf16 %v2945_v32, %v2945_v32 }
0x1032   : > { %v4331_v34 = vpop.eup %4330 }
0x1033   : > { %v2944_v35 = vmul.f32 %v4331_v34, %v5060_v16  ;;  %4153 = vmatmul.mubr.msk.bf16.vlgmr.msra.gmra.mrb[36].mxu1 %vm1254_vm2, %v2949_v33 }
0x1034   : > { %4168 = vmatprep.mubr.msk.bf16.mxu1 %vm4404_vm1, %v4403_v8 }
0x1035   : > { %v2948_v36 = vpack.c.bf16 %v2944_v35, %v2944_v35 }
0x1037   : > { %4147 = vmatmul.mubr.msk.bf16.vlgmr.msra.gmra.mrb[40].mxu0 %vm1254_vm2, %v2948_v36  ;;  %v3878_v36 = vld [vmem:[%s5288_s7 + $0x1] ss:$0 sm:$0xff] }
0x1038   : > { %4160 = vmatprep.mubr.msk.bf16.mxu0 %vm4404_vm1, %v4403_v8  ;;  %4157 = vmatpush3.bf16.msra.mxu0 %v4276_v4  ;;  %v4285_v4 = vld [vmem:[%s5293_s12 + $0x68] sm:$0xff]  }
0x1039   : > { %4158 = vmatprep.subr.bf16.mxu0 %v4403_v8 }
0x103c   : > { %4159 = vmatpush3.bf16.msra.mxu0 %v4277_v19 }
0x103d   : > { %4172 = vmatprep.subr.bf16.mxu0 %v4403_v8 }
0x10e5   : > { %v2990_v38 = vpop.f32.mrb[36].mxu0 }
0x10e6   : > { %v4136_v39 = vpop.f32.mrb[37].mxu0 }
0x10e7   : > { %v2993_v40 = vpop.f32.mrb[38].mxu0  ;;  %v3036_v41 = vpop.f32.mrb[32].mxu1 }
0x10e8   : > { %v4137_v7 = vpop.f32.mrb[39].mxu0  ;;  %v4142_v42 = vpop.f32.mrb[33].mxu1 }
0x10e9   : > { %v3039_v15 = vpop.f32.mrb[34].mxu1 }
0x10ea   : > { %v4143_v43 = vpop.f32.mrb[35].mxu1 }
0x1106   : > { %v3128_v16 = vpop.f32.mrb[36].mxu1 }
0x1107   : > { %v3150_v44 = vcombine.low %v3036_v41, %v3128_v16  ;;  %v3151_v17 = vcombine.high %v3036_v41, %v3128_v16  ;;  %v4154_v47 = vpop.f32.mrb[37].mxu1 }
0x1108   : > { %v3131_v48 = vpop.f32.mrb[38].mxu1 }
0x1109   : > { %v4155_v49 = vpop.f32.mrb[39].mxu1  ;;  %v3158_v60 = vrot.slane %v3150_v44, %v4632_v37  ;;  %v3165_v61 = vrot.slane %v3151_v17, %v4632_v37  ;;  %v4278_v48 = vld [vmem:[%s5291_s10 + $0x10] sm:$0xff]  }
0x110a   : > { %v3082_v53 = vpop.f32.mrb[40].mxu0  ;;  %4165 = vmatpush3.bf16.msra.mxu1 %v4278_v48  ;;  %v4279_v49 = vld [vmem:[%s5291_s10 + $0x18] sm:$0xff]   ;;  %v3615_v48 = vld [vmem:[%s5298_s17] sm:$0x1] }
0x110b   : > { %v3134_v55 = vcombine.low %v2990_v38, %v3082_v53  ;;  %v3135_v56 = vcombine.high %v2990_v38, %v3082_v53  ;;  %v4148_v58 = vpop.f32.mrb[41].mxu0  ;;  %4166 = vmatprep.subr.bf16.mxu1 %v4403_v8 }
0x110c   : > { %v3085_v59 = vpop.f32.mrb[42].mxu0  ;;  %v3884_v58 = vld [vmem:[%s5289_s8 + $0x1] ss:$0 sm:$0xff] }
0x110d   : > { %v3142_v45 = vrot.slane %v3134_v55, %v4632_v37  ;;  %v3149_v62 = vrot.slane %v3135_v56, %v4632_v37  ;;  %v4149_v63 = vpop.f32.mrb[43].mxu0 }
0x110e   : > { %4167 = vmatpush3.bf16.msra.mxu1 %v4279_v49  ;;  %v4280_v63 = vld [vmem:[%s5293_s12 + $0x40] sm:$0xff]  }
0x110f   : > { %v3166_v26 = vcombine.low %v3142_v45, %v3158_v60  ;;  %v3167_v0 = vcombine.high %v3142_v45, %v3158_v60  ;;  %v3182_v1 = vcombine.low %v3149_v62, %v3165_v61  ;;  %v3183_v2 = vcombine.high %v3149_v62, %v3165_v61  ;;  %4192 = vmatprep.subr.bf16.mxu1 %v4403_v8  ;;  %v3885_v60 = vld [vmem:[%s5290_s9 + $0x1] ss:$0 sm:$0xff] }
0x1111   : > { %v3174_v13 = vrot.slane %v3166_v26, %v4642_v46  ;;  %v3181_v5 = vrot.slane %v3167_v0, %v4642_v46  ;;  %v3190_v50 = vrot.slane %v3182_v1, %v4642_v46  ;;  %v3197_v51 = vrot.slane %v3183_v2, %v4642_v46  ;;  %v4281_v26 = vld [vmem:[%s5293_s12 + $0x48] sm:$0xff]   ;;  %v4282_v0 = vld [vmem:[%s5293_s12 + $0x50] sm:$0xff]   ;;  %v4283_v1 = vld [vmem:[%s5293_s12 + $0x58] sm:$0xff]  }
0x1112   : > { %v4284_v2 = vld [vmem:[%s5293_s12 + $0x60] sm:$0xff]  }
0x1113   : > { %v3202_v52 = vcombine.low %v3174_v13, %v3181_v5  ;;  %v3871_v54 = vcombine.high %v3174_v13, %v3181_v5  ;;  %v3218_v18 = vcombine.low %v3190_v50, %v3197_v51  ;;  %v3872_v25 = vcombine.high %v3190_v50, %v3197_v51  ;;  %v4286_v13 = vld [vmem:[%s5293_s12 + $0x70] sm:$0xff]   ;;  %v4287_v5 = vld [vmem:[%s5293_s12 + $0x78] sm:$0xff]   ;;  %v3891_v50 = vld [vmem:[%s5292_s11 + $0x1] ss:$0 sm:$0xff] }
0x1115   : > { %v3209_v9 = vrot.slane %v3202_v52, %v4632_v37  ;;  %v3217_v10 = vrot.slane %v3871_v54, %v4632_v37  ;;  %v3225_v11 = vrot.slane %v3218_v18, %v4632_v37  ;;  %v3233_v12 = vrot.slane %v3872_v25, %v4632_v37 }
0x1117   : > { %v3235_v14 = vcombine.high %v3209_v9, %v3217_v10  ;;  %v3251_v20 = vcombine.high %v3225_v11, %v3233_v12  ;;  %v3234_v21 = vcombine.low %v3209_v9, %v3217_v10  ;;  %v3250_v22 = vcombine.low %v3225_v11, %v3233_v12 }
0x1119   : > { %v3249_v23 = vrot.slane %v3235_v14, %v4642_v46  ;;  %v3265_v24 = vrot.slane %v3251_v20, %v4642_v46  ;;  %v3242_v30 = vrot.slane %v3234_v21, %v4642_v46  ;;  %v3258_v57 = vrot.slane %v3250_v22, %v4642_v46 }
0x111b   : > { %v3268_v28 = vcombine.low %v3249_v23, %v3265_v24  ;;  %v3267_v3 = vcombine.high %v3242_v30, %v3258_v57  ;;  %v3269_v29 = vcombine.high %v3249_v23, %v3265_v24  ;;  %v3266_v27 = vcombine.low %v3242_v30, %v3258_v57  ;;  %v3912_v24 = vld [vmem:[%s5294_s13 + $0x1] ss:$0 sm:$0xff] }
0x111d   : > { %3275 = vrot.lane.b32.xlu1 %v3268_v28, %s5339_s28  ;;  %3271 = vrot.lane.b32.xlu0 %v3267_v3, %s5340_s25  ;;  %s5239_s25 = scalar_lea.hbm %s5301_s20, %s3931_s21 }
0x1121   : > { %3279 = vrot.lane.b32.xlu0 %v3269_v29, %s5341_s30  ;;  %s629_s30 = sand.u32 1, %s4393_s22  }
0x1122   : > { %s630_s29 = scalar_lea.vmem [#allocation2], %s629_s30  ;;  %s3735_s0 = scalar_lea.sflag [#allocation3], %s629_s30 }
0x1123   : > { %s3747_s27 = sshll.u32 %s630_s29, 4  ;;  %s5241_s27 = int_to_ptr.vmem [resolvable:$true] %s3747_s27 }
0x1124   : > { %s4339_s2 = scalar_lea.vmem %s5241_s27, 16  ;;  %p4346_p0 = scmp.lt.s32.totalorder %s5241_s27, %s4344_s3 }
0x1125   : > { %p4340_p11 = scmp.ne.s32.totalorder %s5241_s27, %s4339_s2  ;;  %p4347_p1 = scmp.lt.s32.totalorder %s4345_s26, %s4339_s2 }
0x1127   : > { %p4341_p12 = pnand %p4340_p11, %p4560_p5  ;;  %p4348_p2 = por %p4347_p1, %p4346_p0 }
0x1129   : > { %p4342_p13 = pneg %p4341_p12 }
0x112b   : > { %p4349_p3 = pnand %p4348_p2, %p4342_p13 }
0x118f   : > { %v3272_v37 = vpop.permute.xlu0 %3271  ;;  %v3276_v31 = vpop.permute.xlu1 %3275 }
0x1190   : > { %v3282_v32 = vsel %vm1254_vm2, %v3266_v27, %v3272_v37 }
0x1191   : > { %v3283_v34 = vsel %vm1821_vm4, %v3282_v32, %v3276_v31 }
0x1193   : > { %v3280_v33 = vpop.permute.xlu0 %3279 }
0x1194   : > { %v3284_v35 = vsel %vm1823_vm5, %v3283_v34, %v3280_v33 }
0x1195   : > { %v3290_v46 = vpack.c.bf16 %v3284_v35, %v3284_v35 }
0x1197   : > { %4161 = vmatmul.mubr.msk.bf16.vlgmr.msra.gmra.mrb[44].mxu0 %vm642_vm0, %v3290_v46  ;;  %v4288_v46 = vld [vmem:[%s5297_s16] sm:$0xff]  }
0x1198   : > { %4188 = vmatprep.mubr.msk.bf16.mxu0 %vm4404_vm1, %v4403_v8  ;;  %4173 = vmatpush3.bf16.msra.mxu0 %v4280_v63 }
0x1199   : > { %4174 = vmatprep.subr.bf16.mxu0 %v4403_v8 }
0x119c   : > { %4175 = vmatpush3.bf16.msra.mxu0 %v4281_v26 }
0x119d   : > { %4176 = vmatprep.subr.bf16.mxu0 %v4403_v8 }
0x11a0   : > { %4177 = vmatpush3.bf16.msra.mxu0 %v4282_v0 }
0x11a1   : > { %4178 = vmatprep.subr.bf16.mxu0 %v4403_v8 }
0x11a4   : > { %4179 = vmatpush3.bf16.msra.mxu0 %v4283_v1 }
0x11a5   : > { %4180 = vmatprep.subr.bf16.mxu0 %v4403_v8 }
0x11a8   : > { %4181 = vmatpush3.bf16.msra.mxu0 %v4284_v2 }
0x11a9   : > { %4182 = vmatprep.subr.bf16.mxu0 %v4403_v8 }
0x11ac   : > { %4183 = vmatpush3.bf16.msra.mxu0 %v4285_v4 }
0x11ad   : > { %4184 = vmatprep.subr.bf16.mxu0 %v4403_v8 }
0x11b0   : > { %4185 = vmatpush3.bf16.msra.mxu0 %v4286_v13 }
0x11b1   : > { %4186 = vmatprep.subr.bf16.mxu0 %v4403_v8 }
0x11b4   : > { %4187 = vmatpush3.bf16.msra.mxu0 %v4287_v5 }
0x126a   : > { %v3348_v38 = vpop.f32.mrb[44].mxu0 }
0x126b   : > { %v3349_v39 = vadd.f32 %v3878_v36, %v3348_v38  ;;  %v4162_v40 = vpop.f32.mrb[45].mxu0  ;;  %v4289_v36 = vld [vmem:[%s5297_s16 + $0x8] sm:$0xff]  }
0x126c   : > { %v3351_v41 = vpop.f32.mrb[46].mxu0 }
0x126d   : > { %v4163_v7 = vpop.f32.mrb[47].mxu0  ;;  %v3354_v42 = vadd.f32 %v3349_v39, %v4917_v6 }
0x126e   : > { %v3923_v7 = vld [vmem:[%s5295_s14 + $0x1] ss:$0 sm:$0xff] }
0x126f   : > { %v3359_v15 = vsel %vm642_vm0, %v3354_v42, 0.0 }
0x1270   : > { %3360 = vadd.xlane.f32.xlu1 %v3359_v15  ;;  %v3924_v15 = vld [vmem:[%s5296_s15 + $0x1] ss:$0 sm:$0xff] }
0x12fd   : > { %v3361_v43 = vpop.xlane.xlu1 %3360 }
0x12fe   : > { %v3362_v16 = vmul.f32 0.03125, %v3361_v43 }
0x1300   : > { %v3363_v44 = vsub.f32 %v3354_v42, %v3362_v16 }
0x1302   : > { %v3364_v17 = vmul.f32 %v3363_v44, %v3363_v44 }
0x1304   : > { %v3365_v47 = vsel %vm642_vm0, %v3364_v17, 0.0  ;;  %v4290_v17 = vld [vmem:[%s5299_s18] sm:$0xff]  }
0x1305   : > { %3366 = vadd.xlane.f32.xlu0 %v3365_v47  ;;  %v4291_v47 = vld [vmem:[%s5299_s18 + $0x8] sm:$0xff]  }
0x1392   : > { %v3367_v6 = vpop.xlane.xlu0 %3366 }
0x1393   : > { %v3368_v53 = vmul.f32 0.03125, %v3367_v6 }
0x1395   : > { %v3369_v55 = vadd.f32 1e-12, %v3368_v53 }
0x1397   : > { %4332 = vrsqrt.f32 %v3369_v55 }
0x13a1   : > { %v4333_v56 = vpop.eup %4332 }
0x13a2   : > { %v3371_v59 = vmul.f32 %v4333_v56, %v3363_v44 }
0x13a4   : > { %v3378_v61 = vmul.f32 %v3884_v58, %v3371_v59 }
0x13a6   : > { %v3385_v45 = vadd.f32 %v3885_v60, %v3378_v61 }
0x13a8   : > { %v3391_v62 = vpack.c.bf16 %v3385_v45, %v3385_v45 }
0x13aa   : > { %4169 = vmatmul.mubr.msk.bf16.vlgmr.msra.gmra.mrb[40].mxu1 %vm642_vm0, %v3391_v62 }
0x13ab   : > { %4196 = vmatprep.mubr.msk.bf16.mxu1 %vm4404_vm1, %v4403_v8  ;;  %4193 = vmatpush3.bf16.msra.mxu1 %v4288_v46 }
0x13ac   : > { %4194 = vmatprep.subr.bf16.mxu1 %v4403_v8 }
0x13af   : > { %4195 = vmatpush3.bf16.msra.mxu1 %v4289_v36 }
0x13b0   : > { %4200 = vmatprep.subr.bf16.mxu1 %v4403_v8 }
0x147d   : > { %v3449_v51 = vpop.f32.mrb[40].mxu1 }
0x147e   : > { %v3450_v52 = vadd.f32 %v3891_v50, %v3449_v51  ;;  %v4170_v54 = vpop.f32.mrb[41].mxu1 }
0x147f   : > { %v3452_v18 = vpop.f32.mrb[42].mxu1 }
0x1480   : > { %v3455_v25 = vmul.f32 %v3450_v52, %v3450_v52  ;;  %v4171_v19 = vpop.f32.mrb[43].mxu1 }
0x1482   : > { %v3456_v9 = vmul.f32 %v3455_v25, %v3450_v52 }
0x1484   : > { %v3457_v10 = vmul.f32 0.044715, %v3456_v9 }
0x1486   : > { %v3458_v11 = vadd.f32 %v3457_v10, %v3450_v52 }
0x1488   : > { %v3459_v12 = vmul.f32 0.7978846, %v3458_v11 }
0x148a   : > { %4334 = vtanh.f32 %v3459_v12 }
0x1494   : > { %v4335_v14 = vpop.eup %4334 }
0x1495   : > { %v3461_v20 = vadd.f32 1.0, %v4335_v14 }
0x1497   : > { %v3462_v21 = vmul.f32 0.5, %v3461_v20 }
0x1499   : > { %v3463_v22 = vmul.f32 %v3462_v21, %v3450_v52 }
0x149b   : > { %v3481_v23 = vpack.c.bf16 %v3463_v22, %v3463_v22 }
0x149d   : > { %4189 = vmatmul.mubr.bf16.vlgmr.msra.gmra.mrb[48].mxu0 %v3481_v23 }
0x1570   : > { %v3572_v30 = vpop.f32.mrb[48].mxu0 }
0x1571   : > { %v3573_v57 = vadd.f32 %v3912_v24, %v3572_v30  ;;  %v4190_v28 = vpop.f32.mrb[49].mxu0 }
0x1572   : > { %v3575_v3 = vpop.f32.mrb[50].mxu0 }
0x1573   : > { %v4191_v29 = vpop.f32.mrb[51].mxu0  ;;  %v3578_v27 = vadd.f32 %v3573_v57, %v3385_v45 }
0x1575   : > { %v3583_v37 = vsel %vm642_vm0, %v3578_v27, 0.0 }
0x1576   : > { %3584 = vadd.xlane.f32.xlu0 %v3583_v37 }
0x1603   : > { %v3585_v31 = vpop.xlane.xlu0 %3584 }
0x1604   : > { %v3586_v32 = vmul.f32 0.03125, %v3585_v31 }
0x1606   : > { %v3587_v33 = vsub.f32 %v3578_v27, %v3586_v32 }
0x1608   : > { %v3588_v34 = vmul.f32 %v3587_v33, %v3587_v33 }
0x160a   : > { %v3589_v35 = vsel %vm642_vm0, %v3588_v34, 0.0 }
0x160b   : > { %3590 = vadd.xlane.f32.xlu1 %v3589_v35 }
0x1698   : > { %v3591_v38 = vpop.xlane.xlu1 %3590 }
0x1699   : > { %v3592_v39 = vmul.f32 0.03125, %v3591_v38 }
0x169b   : > { %v3593_v40 = vadd.f32 1e-12, %v3592_v39 }
0x169d   : > { %4336 = vrsqrt.f32 %v3593_v40 }
0x16a7   : > { %v4337_v41 = vpop.eup %4336 }
0x16a8   : > { %v3595_v42 = vmul.f32 %v4337_v41, %v3587_v33 }
0x16aa   : > { %v3602_v43 = vmul.f32 %v3923_v7, %v3595_v42 }
0x16ac   : > { %v3609_v16 = vadd.f32 %v3924_v15, %v3602_v43 }
0x16ae   : > { %v3614_v44 = vpack.c.bf16 %v3609_v16, %v3609_v16 }
0x16b0   : > { %4197 = vmatmul.mubr.msk.bf16.vlgmr.msra.gmra.mrb[44].mxu1 %vm642_vm0, %v3614_v44 }
0x16b1   : > { %4204 = vmatprep.mubr.msk.bf16.mxu1 %vm4404_vm1, %v4403_v8  ;;  %4201 = vmatpush3.bf16.msra.mxu1 %v4290_v17 }
0x16b2   : > { %4202 = vmatprep.subr.bf16.mxu1 %v4403_v8  ;;  %v3677_v8 = vld [vmem:[%s5300_s19] sm:$0x1] }
0x16b5   : > { %4203 = vmatpush3.bf16.msra.mxu1 %v4291_v47 }
0x1783   : > { %v3665_v49 = vpop.f32.mrb[44].mxu1 }
0x1784   : > { %v3666_v6 = vadd.f32 %v3665_v49, %v3615_v48  ;;  %v4198_v53 = vpop.f32.mrb[45].mxu1 }
0x1785   : > { %v3668_v55 = vpop.f32.mrb[46].mxu1 }
0x1786   : > { %v3671_v56 = vmax.f32 %v3666_v6, 0.0  ;;  %v4199_v58 = vpop.f32.mrb[47].mxu1 }
0x1788   : > { %v3676_v59 = vpack.c.bf16 %v3671_v56, %v3671_v56 }
0x178a   : > { %4205 = vmatmul.mubr.msk.bf16.vlgmr.msra.gmra.mrb[48].mxu1 %vm642_vm0, %v3676_v59 }
0x185d   : > { %v3727_v60 = vpop.f32.mrb[48].mxu1 }
0x185e   : > { %v3728_v61 = vadd.f32 %v3727_v60, %v3677_v8  ;;  %v4206_v45 = vpop.f32.mrb[49].mxu1 }
0x185f   : > { %v3730_v62 = vpop.f32.mrb[50].mxu1 }
0x1860   : > { %3733 = vst [vmem:[%s630_s29] sm:$0x1] %v3728_v61  ;;  %v4207_v63 = vpop.f32.mrb[51].mxu1 }
0x1861   : > { %4352 = shalt.err (!%p4349_p3)
}
0x1862   : > { %s4353_s30 = scalar_lea.hbm %s5239_s25, 16  ;;  %s4357_s28 = scalar_lea.hbm %s5301_s20, 32 }
0x1863   : > { %p4354_p4 = scmp.ne.s32.totalorder %s5239_s25, %s4353_s30  ;;  %p4358_p9 = scmp.lt.u32.totalorder %s5239_s25, %s5301_s20 }
0x1864   : > { %p4359_p10 = scmp.lt.u32.totalorder %s4357_s28, %s4353_s30  ;;  %p4361_p12 = scmp.lt.u32.totalorder %s4353_s30, %s5239_s25 }
0x1865   : > { %p4355_p7 = pnand %p4354_p4, %p4560_p5 }
0x1866   : > { %p4360_p11 = por %p4359_p10, %p4358_p9 }
0x1867   : > { %p4356_p8 = pneg %p4355_p7 }
0x1868   : > { %p4362_p13 = por %p4361_p12, %p4360_p11 }
0x186a   : > { %p4363_p0 = pnand %p4362_p13, %p4356_p8 }
0x186c   : > { %4366 = shalt.err (!%p4363_p0)
}
0x186d   : > { %4208 = dma.vmem_to_hbm [thread:$0]  (%p4560_p5), %s5241_s27, 16, %s5239_s25, %s3735_s0  }
0x186e PF: > { %p4214_p1 = scmp.ge.s32.totalorder %s4401_s24, 2  ;;  %s3759_s26 = sand.u32 1, %s4389_s1  }
0x186f   : > { %s3760_s21 = scalar_lea.sflag [#allocation3], %s3759_s26 }
0x1870   : > { %p4211_p2 = pnand %p4214_p1, %p4564_p6 }
0x1872   : > { %4384 = dma.done.wait (!%p4211_p2), %s3760_s21, 16  }
0x1873   : > { %4386 = vsyncadd (!%p4211_p2), %s3760_s21, 4294967280  ;;  %s5343_s24 = sld [smem:[#allocation6_spill]]  ;;  %s5344_s30 = sld [smem:[#allocation5_spill]] }
0x1874   : > { %s5345_s23 = sld [smem:[#allocation7_spill]]  ;;  %s5346_s1 = smov %s4393_s22 }
0x1879   : > { %p30_p3 = scmp.ge.s32.totalorder %s5343_s24, 4   ;;  %s5347_s22 = smov %s5344_s30 }
0x187b   :  { %32 = sbr.rel (!%p30_p3) target bundleno = 9 (0x9), region = 150 }
0x1882   :  { %3764 = vsyncpa [#allocation3], 1 }
0x1883   :  { %3766 = vsyncpa [#allocation3 + $0x1], 1 }

</bundles_post_ra>
